<compile_context>
chip_gen: v5e
topology: v5e:2x2
jax: 0.10.0
libtpu: 0.0.40
codegen_flags: <defaults>
</compile_context>

<pallas_src>
import jax
import jax.numpy as jnp
from jax.experimental import pallas as pl
from jax.experimental.pallas import tpu as pltpu

# Logical (PyTorch) hidden sizes and padded (TPU-friendly) sizes.
H1 = 400
H2 = 300
H1_PAD = 512           # 400 -> 512 (multiple of 128; keeps layer-1 lane-dense)
H2_PAD = 384           # 300 -> 384 (128-aligned; 25% less weight DMA than 512)
OUT_LANE = 128         # output padded to a full 128-lane vreg row


def _round_up(x, m):
    return ((x + m - 1) // m) * m


def _cdiv(a, b):
    return -(-a // b)


def _pad_to(x, shape):
    return jnp.pad(x, [(0, s - d) for d, s in zip(x.shape, shape)])


def _num_tensorcores_per_chip():
    """2 on v7x (megacore split worth it), 1 on v5e/v6e. Best-effort heuristic."""
    try:
        kind = jax.devices()[0].device_kind.lower()
    except Exception:
        return 1
    return 2 if "v7" in kind else 1


def actor_mlp_kernel(x_ref, w1_ref, b1_ref, w2_ref, b2_ref, w3_ref, b3_ref, out_ref):
    """Fused 3-layer MLP for one batch tile.

    Weights are bf16 (DMA'd once, resident across the batch grid); matmul
    inputs are cast to bf16 so the MXU runs natively, accumulation and all
    elementwise bias/ReLU math stays in f32 (v5e-safe).
    """
    x = x_ref[...].astype(jnp.bfloat16)
    h1 = jnp.dot(x, w1_ref[...], preferred_element_type=jnp.float32) + b1_ref[...]
    h1 = jnp.maximum(h1, 0.0)
    h2 = jnp.dot(h1.astype(jnp.bfloat16), w2_ref[...],
                 preferred_element_type=jnp.float32) + b2_ref[...]
    h2 = jnp.maximum(h2, 0.0)
    out = jnp.dot(h2.astype(jnp.bfloat16), w3_ref[...],
                  preferred_element_type=jnp.float32) + b3_ref[...]
    out_ref[...] = out.astype(out_ref.dtype)


def actor_forward(state, params, output_dim, *, tile_b=512,
                  out_dtype=jnp.float32, trim_output=True):
    """Runs the fused actor MLP Pallas kernel.

    state:  [B, input_dim] float32
    params: packed params from pack_actor_params():
        w1 [in, 512] bf16, b1 [1, 512] f32,
        w2 [512, 384] bf16, b2 [1, 384] f32,
        w3 [384, OUT_PAD] bf16, b3 [1, OUT_PAD] f32.
    Returns [B, output_dim] (or the padded [B_pad, OUT_PAD] buffer if
    trim_output=False, so a downstream jit can fuse the slice).
    """
    B, d_in = state.shape
    H1p = params["w1"].shape[1]
    H2p = params["w2"].shape[1]
    OUTp = params["w3"].shape[1]

    # --- batch tile selection -------------------------------------------------
    # Enough tiles to cap the tile at tile_b; at least num_tc tiles when the
    # batch is big enough that splitting across v7x's two TensorCores beats the
    # duplicated ~0.5 MiB weight fetch; tile size derived from ceil(B/n_tiles)
    # so awkward batch sizes (e.g. 129) don't pad up to a whole extra tile.
    num_tc = _num_tensorcores_per_chip()
    n_tiles = max(1, _cdiv(B, tile_b))
    if num_tc > 1 and B >= 256:
        n_tiles = max(n_tiles, num_tc)
    tb = _round_up(_cdiv(B, n_tiles), 8)       # sublane-aligned
    b_pad = _round_up(B, tb)
    if b_pad != B:
        state = jnp.pad(state, ((0, b_pad - B), (0, 0)))
    grid = (b_pad // tb,)

    def run(weight_mode):
        def wspec(shape):
            # Weights/biases: constant block index -> fetched once, resident.
            if weight_mode is None:
                return pl.BlockSpec(shape, lambda i: (0, 0))
            return pl.BlockSpec(shape, lambda i: (0, 0), pipeline_mode=weight_mode)

        return pl.pallas_call(
            actor_mlp_kernel,
            out_shape=jax.ShapeDtypeStruct((b_pad, OUTp), out_dtype),
            grid_spec=pltpu.PrefetchScalarGridSpec(
                num_scalar_prefetch=0,
                grid=grid,
                in_specs=[
                    # state: tiled along batch
                    pl.BlockSpec((tb, d_in), lambda i: (i, 0)),
                    wspec((d_in, H1p)),
                    wspec((1, H1p)),
                    wspec((H1p, H2p)),
                    wspec((1, H2p)),
                    wspec((H2p, OUTp)),
                    wspec((1, OUTp)),
                ],
                out_specs=pl.BlockSpec((tb, OUTp), lambda i: (i, 0)),
            ),
            compiler_params=pltpu.CompilerParams(
                dimension_semantics=("parallel",),
            ),
        )(state, params["w1"], params["b1"], params["w2"], params["b2"],
          params["w3"], params["b3"])

    # Weight blocks never change block index, so double-buffering them only
    # wastes VMEM + bookkeeping; request single-buffering, fall back if the
    # installed JAX rejects pipeline_mode / Buffered(1).
    try:
        single = pl.Buffered(1)
    except Exception:
        single = None
    try:
        out = run(single)
    except Exception:
        if single is None:
            raise
        out = run(None)

    if trim_output:
        out = out[:B, :output_dim]
    return out


def init_actor_params_f32(key, input_dim, output_dim, init_w=0.003):
    """Mirrors nn.Linear default init (+ uniform(-init_w, init_w) on layer 3).

    Weights stored [in, out] so the kernel computes x @ W + b, identical to
    PyTorch's x @ W.T + b. Pure f32, un-padded (the ground-truth reference).
    """
    k1, k2, k3, k4, k5, k6 = jax.random.split(key, 6)

    def uniform(k, shape, bound):
        return jax.random.uniform(k, shape, jnp.float32, -bound, bound)

    bound1 = 1.0 / (input_dim ** 0.5)
    bound2 = 1.0 / (H1 ** 0.5)
    return {
        "w1": uniform(k1, (input_dim, H1), bound1),
        "b1": uniform(k2, (1, H1), bound1),
        "w2": uniform(k3, (H1, H2), bound2),
        "b2": uniform(k4, (1, H2), bound2),
        "w3": uniform(k5, (H2, output_dim), init_w),
        "b3": uniform(k6, (1, output_dim), init_w),
    }


def pack_actor_params(p):
    """Zero-pads to TPU-friendly shapes and casts weights to bf16 (done once at
    init time). Padded rows/columns are zero, so they stay exactly 0 through
    ReLU and never change the logical output."""
    input_dim = p["w1"].shape[0]
    output_dim = p["w3"].shape[1]
    out_pad = max(OUT_LANE, _round_up(output_dim, OUT_LANE))
    # TODO(synk): optional int8 (v5e/v6e) / fp8-e4m3 (v7x) quantization of w2
    # with per-output-column scales would halve the dominant weight's DMA bytes;
    # kept bf16 here pending accuracy validation.
    return {
        "w1": _pad_to(p["w1"], (input_dim, H1_PAD)).astype(jnp.bfloat16),
        "b1": _pad_to(p["b1"], (1, H1_PAD)),
        "w2": _pad_to(p["w2"], (H1_PAD, H2_PAD)).astype(jnp.bfloat16),
        "b2": _pad_to(p["b2"], (1, H2_PAD)),
        "w3": _pad_to(p["w3"], (H2_PAD, out_pad)).astype(jnp.bfloat16),
        "b3": _pad_to(p["b3"], (1, out_pad)),
    }


def actor_forward_ref_packed(state, params, output_dim):
    """Plain-JAX reference using the same packed bf16 weights / f32 accumulation."""
    x = state.astype(jnp.bfloat16)
    h1 = jnp.maximum(
        jnp.dot(x, params["w1"], preferred_element_type=jnp.float32) + params["b1"], 0.0)
    h2 = jnp.maximum(
        jnp.dot(h1.astype(jnp.bfloat16), params["w2"],
                preferred_element_type=jnp.float32) + params["b2"], 0.0)
    out = jnp.dot(h2.astype(jnp.bfloat16), params["w3"],
                  preferred_element_type=jnp.float32) + params["b3"]
    return out[:, :output_dim]


def actor_forward_ref_f32(state, p):
    """Pure-f32, un-padded reference (equivalent to the PyTorch ActorNetwork)."""
    h1 = jnp.maximum(state @ p["w1"] + p["b1"], 0.0)
    h2 = jnp.maximum(h1 @ p["w2"] + p["b2"], 0.0)
    return h2 @ p["w3"] + p["b3"]


if __name__ == "__main__":
    key = jax.random.PRNGKey(0)
    k_params, k_state = jax.random.split(key)

    batch = 2
    input_dim = 16   # state dim
    output_dim = 8   # action dim

    raw_params = init_actor_params_f32(k_params, input_dim, output_dim)
    params = pack_actor_params(raw_params)
    state = jax.random.normal(k_state, (batch, input_dim), jnp.float32)

    out = actor_forward(state, params, output_dim)
    out = jax.block_until_ready(out)
    assert out.shape == (batch, output_dim)

    # Exact (up to f32 accumulation order) vs. a reference built from the same
    # packed bf16 weights.
    ref_packed = actor_forward_ref_packed(state, params, output_dim)
    assert jnp.allclose(out, ref_packed, atol=1e-3, rtol=1e-3), \
        "Pallas kernel mismatch vs packed bf16 reference"

    # Accuracy vs. the true f32, un-padded forward pass (PyTorch-equivalent):
    # only bf16 weight/activation quantization error remains.
    ref_f32 = actor_forward_ref_f32(state, raw_params)
    assert jnp.allclose(out, ref_f32, atol=5e-3, rtol=5e-2), \
        "Pallas kernel mismatch vs pure-f32 reference"

    # TODO(synk): select_action/evaluate_action Gaussian exploration noise is
    # host-side RL plumbing outside the forward pass and not part of this kernel.
    print("KERNEL_OK")
</pallas_src>

<mosaic_0001>
module attributes {stable_mosaic.version = 11 : i64} {
  func.func @actor_mlp_kernel(%arg0: i32, %arg1: memref<8x16xf32, #tpu.memory_space<vmem>>, %arg2: memref<16x512xbf16, #tpu.memory_space<vmem>>, %arg3: memref<1x512xf32, #tpu.memory_space<vmem>>, %arg4: memref<512x384xbf16, #tpu.memory_space<vmem>>, %arg5: memref<1x384xf32, #tpu.memory_space<vmem>>, %arg6: memref<384x128xbf16, #tpu.memory_space<vmem>>, %arg7: memref<1x128xf32, #tpu.memory_space<vmem>>, %arg8: memref<8x128xf32, #tpu.memory_space<vmem>>) attributes {dimension_semantics = [#tpu.dimension_semantics<parallel>], iteration_bounds = array<i64: 1>, scalar_prefetch = 0 : i64, scratch_operands = 0 : i64, tpu.core_type = #tpu.core_type<tc>, window_params = [{transform_indices = @transform_0, window_bounds = array<i64: 8, 16>}, {pipeline_mode = #tpu.pipeline_mode<synchronous>, transform_indices = @transform_1, window_bounds = array<i64: 16, 512>}, {pipeline_mode = #tpu.pipeline_mode<synchronous>, transform_indices = @transform_2, window_bounds = array<i64: 1, 512>}, {pipeline_mode = #tpu.pipeline_mode<synchronous>, transform_indices = @transform_3, window_bounds = array<i64: 512, 384>}, {pipeline_mode = #tpu.pipeline_mode<synchronous>, transform_indices = @transform_4, window_bounds = array<i64: 1, 384>}, {pipeline_mode = #tpu.pipeline_mode<synchronous>, transform_indices = @transform_5, window_bounds = array<i64: 384, 128>}, {pipeline_mode = #tpu.pipeline_mode<synchronous>, transform_indices = @transform_6, window_bounds = array<i64: 1, 128>}, {transform_indices = @transform_7, window_bounds = array<i64: 8, 128>}]} {
    %c0 = arith.constant 0 : index
    %c0_0 = arith.constant 0 : index
    %0 = vector.load %arg1[%c0, %c0_0] : memref<8x16xf32, #tpu.memory_space<vmem>>, vector<8x16xf32>
    %1 = arith.truncf %0 : vector<8x16xf32> to vector<8x16xbf16>
    %c0_1 = arith.constant 0 : index
    %c0_2 = arith.constant 0 : index
    %2 = vector.load %arg2[%c0_1, %c0_2] : memref<16x512xbf16, #tpu.memory_space<vmem>>, vector<16x512xbf16>
    %cst = arith.constant dense<0.000000e+00> : vector<8x512xf32>
    %3 = tpu.matmul %1, %2, %cst {dimension_numbers = #tpu.dot_dimension_numbers<[1], [0], [0], [1], [0, 0, 1, 1], [], []>} : vector<8x16xbf16>, vector<16x512xbf16>, vector<8x512xf32> -> vector<8x512xf32>
    %c0_3 = arith.constant 0 : index
    %c0_4 = arith.constant 0 : index
    %4 = vector.load %arg3[%c0_3, %c0_4] : memref<1x512xf32, #tpu.memory_space<vmem>>, vector<1x512xf32>
    %5 = vector.broadcast %4 : vector<1x512xf32> to vector<8x512xf32>
    %6 = arith.addf %3, %5 : vector<8x512xf32>
    %cst_5 = arith.constant 0.000000e+00 : f32
    %7 = vector.broadcast %cst_5 : f32 to vector<8x512xf32>
    %8 = arith.maximumf %6, %7 : vector<8x512xf32>
    %9 = arith.truncf %8 : vector<8x512xf32> to vector<8x512xbf16>
    %c0_6 = arith.constant 0 : index
    %c0_7 = arith.constant 0 : index
    %10 = vector.load %arg4[%c0_6, %c0_7] : memref<512x384xbf16, #tpu.memory_space<vmem>>, vector<512x384xbf16>
    %cst_8 = arith.constant dense<0.000000e+00> : vector<8x384xf32>
    %11 = tpu.matmul %9, %10, %cst_8 {dimension_numbers = #tpu.dot_dimension_numbers<[1], [0], [0], [1], [0, 0, 1, 1], [], []>} : vector<8x512xbf16>, vector<512x384xbf16>, vector<8x384xf32> -> vector<8x384xf32>
    %c0_9 = arith.constant 0 : index
    %c0_10 = arith.constant 0 : index
    %12 = vector.load %arg5[%c0_9, %c0_10] : memref<1x384xf32, #tpu.memory_space<vmem>>, vector<1x384xf32>
    %13 = vector.broadcast %12 : vector<1x384xf32> to vector<8x384xf32>
    %14 = arith.addf %11, %13 : vector<8x384xf32>
    %cst_11 = arith.constant 0.000000e+00 : f32
    %15 = vector.broadcast %cst_11 : f32 to vector<8x384xf32>
    %16 = arith.maximumf %14, %15 : vector<8x384xf32>
    %17 = arith.truncf %16 : vector<8x384xf32> to vector<8x384xbf16>
    %c0_12 = arith.constant 0 : index
    %c0_13 = arith.constant 0 : index
    %18 = vector.load %arg6[%c0_12, %c0_13] : memref<384x128xbf16, #tpu.memory_space<vmem>>, vector<384x128xbf16>
    %cst_14 = arith.constant dense<0.000000e+00> : vector<8x128xf32>
    %19 = tpu.matmul %17, %18, %cst_14 {dimension_numbers = #tpu.dot_dimension_numbers<[1], [0], [0], [1], [0, 0, 1, 1], [], []>} : vector<8x384xbf16>, vector<384x128xbf16>, vector<8x128xf32> -> vector<8x128xf32>
    %c0_15 = arith.constant 0 : index
    %c0_16 = arith.constant 0 : index
    %20 = vector.load %arg7[%c0_15, %c0_16] : memref<1x128xf32, #tpu.memory_space<vmem>>, vector<1x128xf32>
    %21 = vector.broadcast %20 : vector<1x128xf32> to vector<8x128xf32>
    %22 = arith.addf %19, %21 : vector<8x128xf32>
    %c0_17 = arith.constant 0 : index
    %c0_18 = arith.constant 0 : index
    %23 = vector.load %arg8[%c0_17, %c0_18] : memref<8x128xf32, #tpu.memory_space<vmem>>, vector<8x128xf32>
    tpu.vector_store %arg8[%c0_17, %c0_18], %22 {strides = array<i32>} : memref<8x128xf32, #tpu.memory_space<vmem>>, vector<8x128xf32>,
    return
  }
  func.func @transform_0(%arg0: i32) -> (i32, i32) {
    %c0_i32 = arith.constant 0 : i32
    %c0_i32_0 = arith.constant 0 : i32
    return %arg0, %c0_i32 : i32, i32
  }
  func.func @transform_1(%arg0: i32) -> (i32, i32) {
    %c0_i32 = arith.constant 0 : i32
    %c0_i32_0 = arith.constant 0 : i32
    %c0_i32_1 = arith.constant 0 : i32
    return %c0_i32, %c0_i32_0 : i32, i32
  }
  func.func @transform_2(%arg0: i32) -> (i32, i32) {
    %c0_i32 = arith.constant 0 : i32
    %c0_i32_0 = arith.constant 0 : i32
    %c0_i32_1 = arith.constant 0 : i32
    return %c0_i32, %c0_i32_0 : i32, i32
  }
  func.func @transform_3(%arg0: i32) -> (i32, i32) {
    %c0_i32 = arith.constant 0 : i32
    %c0_i32_0 = arith.constant 0 : i32
    %c0_i32_1 = arith.constant 0 : i32
    return %c0_i32, %c0_i32_0 : i32, i32
  }
  func.func @transform_4(%arg0: i32) -> (i32, i32) {
    %c0_i32 = arith.constant 0 : i32
    %c0_i32_0 = arith.constant 0 : i32
    %c0_i32_1 = arith.constant 0 : i32
    return %c0_i32, %c0_i32_0 : i32, i32
  }
  func.func @transform_5(%arg0: i32) -> (i32, i32) {
    %c0_i32 = arith.constant 0 : i32
    %c0_i32_0 = arith.constant 0 : i32
    %c0_i32_1 = arith.constant 0 : i32
    return %c0_i32, %c0_i32_0 : i32, i32
  }
  func.func @transform_6(%arg0: i32) -> (i32, i32) {
    %c0_i32 = arith.constant 0 : i32
    %c0_i32_0 = arith.constant 0 : i32
    %c0_i32_1 = arith.constant 0 : i32
    return %c0_i32, %c0_i32_0 : i32, i32
  }
  func.func @transform_7(%arg0: i32) -> (i32, i32) {
    %c0_i32 = arith.constant 0 : i32
    %c0_i32_0 = arith.constant 0 : i32
    return %arg0, %c0_i32 : i32, i32
  }
}

module attributes {stable_mosaic.version = 11 : i64} {
  func.func @actor_mlp_kernel(%arg0: i32, %arg1: memref<8x16xf32, #tpu.memory_space<vmem>>, %arg2: memref<16x512xbf16, #tpu.memory_space<vmem>>, %arg3: memref<1x512xf32, #tpu.memory_space<vmem>>, %arg4: memref<512x384xbf16, #tpu.memory_space<vmem>>, %arg5: memref<1x384xf32, #tpu.memory_space<vmem>>, %arg6: memref<384x128xbf16, #tpu.memory_space<vmem>>, %arg7: memref<1x128xf32, #tpu.memory_space<vmem>>, %arg8: memref<8x128xf32, #tpu.memory_space<vmem>>) attributes {dimension_semantics = [#tpu.dimension_semantics<parallel>], iteration_bounds = array<i64: 1>, scalar_prefetch = 0 : i64, scratch_operands = 0 : i64, tpu.core_type = #tpu.core_type<tc>, window_params = [{transform_indices = @transform_0, window_bounds = array<i64: 8, 16>}, {pipeline_mode = #tpu.pipeline_mode<synchronous>, transform_indices = @transform_1, window_bounds = array<i64: 16, 512>}, {pipeline_mode = #tpu.pipeline_mode<synchronous>, transform_indices = @transform_2, window_bounds = array<i64: 1, 512>}, {pipeline_mode = #tpu.pipeline_mode<synchronous>, transform_indices = @transform_3, window_bounds = array<i64: 512, 384>}, {pipeline_mode = #tpu.pipeline_mode<synchronous>, transform_indices = @transform_4, window_bounds = array<i64: 1, 384>}, {pipeline_mode = #tpu.pipeline_mode<synchronous>, transform_indices = @transform_5, window_bounds = array<i64: 384, 128>}, {pipeline_mode = #tpu.pipeline_mode<synchronous>, transform_indices = @transform_6, window_bounds = array<i64: 1, 128>}, {transform_indices = @transform_7, window_bounds = array<i64: 8, 128>}]} {
    %c0 = arith.constant 0 : index
    %c0_0 = arith.constant 0 : index
    %0 = vector.load %arg1[%c0, %c0_0] : memref<8x16xf32, #tpu.memory_space<vmem>>, vector<8x16xf32>
    %1 = arith.truncf %0 : vector<8x16xf32> to vector<8x16xbf16>
    %c0_1 = arith.constant 0 : index
    %c0_2 = arith.constant 0 : index
    %2 = vector.load %arg2[%c0_1, %c0_2] : memref<16x512xbf16, #tpu.memory_space<vmem>>, vector<16x512xbf16>
    %cst = arith.constant dense<0.000000e+00> : vector<8x512xf32>
    %3 = tpu.matmul %1, %2, %cst {dimension_numbers = #tpu.dot_dimension_numbers<[1], [0], [0], [1], [0, 0, 1, 1], [], []>} : vector<8x16xbf16>, vector<16x512xbf16>, vector<8x512xf32> -> vector<8x512xf32>
    %c0_3 = arith.constant 0 : index
    %c0_4 = arith.constant 0 : index
    %4 = vector.load %arg3[%c0_3, %c0_4] : memref<1x512xf32, #tpu.memory_space<vmem>>, vector<1x512xf32>
    %5 = vector.broadcast %4 : vector<1x512xf32> to vector<8x512xf32>
    %6 = arith.addf %3, %5 : vector<8x512xf32>
    %cst_5 = arith.constant 0.000000e+00 : f32
    %7 = vector.broadcast %cst_5 : f32 to vector<8x512xf32>
    %8 = arith.maximumf %6, %7 : vector<8x512xf32>
    %9 = arith.truncf %8 : vector<8x512xf32> to vector<8x512xbf16>
    %c0_6 = arith.constant 0 : index
    %c0_7 = arith.constant 0 : index
    %10 = vector.load %arg4[%c0_6, %c0_7] : memref<512x384xbf16, #tpu.memory_space<vmem>>, vector<512x384xbf16>
    %cst_8 = arith.constant dense<0.000000e+00> : vector<8x384xf32>
    %11 = tpu.matmul %9, %10, %cst_8 {dimension_numbers = #tpu.dot_dimension_numbers<[1], [0], [0], [1], [0, 0, 1, 1], [], []>} : vector<8x512xbf16>, vector<512x384xbf16>, vector<8x384xf32> -> vector<8x384xf32>
    %c0_9 = arith.constant 0 : index
    %c0_10 = arith.constant 0 : index
    %12 = vector.load %arg5[%c0_9, %c0_10] : memref<1x384xf32, #tpu.memory_space<vmem>>, vector<1x384xf32>
    %13 = vector.broadcast %12 : vector<1x384xf32> to vector<8x384xf32>
    %14 = arith.addf %11, %13 : vector<8x384xf32>
    %cst_11 = arith.constant 0.000000e+00 : f32
    %15 = vector.broadcast %cst_11 : f32 to vector<8x384xf32>
    %16 = arith.maximumf %14, %15 : vector<8x384xf32>
    %17 = arith.truncf %16 : vector<8x384xf32> to vector<8x384xbf16>
    %c0_12 = arith.constant 0 : index
    %c0_13 = arith.constant 0 : index
    %18 = vector.load %arg6[%c0_12, %c0_13] : memref<384x128xbf16, #tpu.memory_space<vmem>>, vector<384x128xbf16>
    %cst_14 = arith.constant dense<0.000000e+00> : vector<8x128xf32>
    %19 = tpu.matmul %17, %18, %cst_14 {dimension_numbers = #tpu.dot_dimension_numbers<[1], [0], [0], [1], [0, 0, 1, 1], [], []>} : vector<8x384xbf16>, vector<384x128xbf16>, vector<8x128xf32> -> vector<8x128xf32>
    %c0_15 = arith.constant 0 : index
    %c0_16 = arith.constant 0 : index
    %20 = vector.load %arg7[%c0_15, %c0_16] : memref<1x128xf32, #tpu.memory_space<vmem>>, vector<1x128xf32>
    %21 = vector.broadcast %20 : vector<1x128xf32> to vector<8x128xf32>
    %22 = arith.addf %19, %21 : vector<8x128xf32>
    %c0_17 = arith.constant 0 : index
    %c0_18 = arith.constant 0 : index
    %23 = vector.load %arg8[%c0_17, %c0_18] : memref<8x128xf32, #tpu.memory_space<vmem>>, vector<8x128xf32>
    tpu.vector_store %arg8[%c0_17, %c0_18], %22 {strides = array<i32>} : memref<8x128xf32, #tpu.memory_space<vmem>>, vector<8x128xf32>,
    return
  }
  func.func @transform_0(%arg0: i32) -> (i32, i32) {
    %c0_i32 = arith.constant 0 : i32
    %c0_i32_0 = arith.constant 0 : i32
    return %arg0, %c0_i32 : i32, i32
  }
  func.func @transform_1(%arg0: i32) -> (i32, i32) {
    %c0_i32 = arith.constant 0 : i32
    %c0_i32_0 = arith.constant 0 : i32
    %c0_i32_1 = arith.constant 0 : i32
    return %c0_i32, %c0_i32_0 : i32, i32
  }
  func.func @transform_2(%arg0: i32) -> (i32, i32) {
    %c0_i32 = arith.constant 0 : i32
    %c0_i32_0 = arith.constant 0 : i32
    %c0_i32_1 = arith.constant 0 : i32
    return %c0_i32, %c0_i32_0 : i32, i32
  }
  func.func @transform_3(%arg0: i32) -> (i32, i32) {
    %c0_i32 = arith.constant 0 : i32
    %c0_i32_0 = arith.constant 0 : i32
    %c0_i32_1 = arith.constant 0 : i32
    return %c0_i32, %c0_i32_0 : i32, i32
  }
  func.func @transform_4(%arg0: i32) -> (i32, i32) {
    %c0_i32 = arith.constant 0 : i32
    %c0_i32_0 = arith.constant 0 : i32
    %c0_i32_1 = arith.constant 0 : i32
    return %c0_i32, %c0_i32_0 : i32, i32
  }
  func.func @transform_5(%arg0: i32) -> (i32, i32) {
    %c0_i32 = arith.constant 0 : i32
    %c0_i32_0 = arith.constant 0 : i32
    %c0_i32_1 = arith.constant 0 : i32
    return %c0_i32, %c0_i32_0 : i32, i32
  }
  func.func @transform_6(%arg0: i32) -> (i32, i32) {
    %c0_i32 = arith.constant 0 : i32
    %c0_i32_0 = arith.constant 0 : i32
    %c0_i32_1 = arith.constant 0 : i32
    return %c0_i32, %c0_i32_0 : i32, i32
  }
  func.func @transform_7(%arg0: i32) -> (i32, i32) {
    %c0_i32 = arith.constant 0 : i32
    %c0_i32_0 = arith.constant 0 : i32
    return %arg0, %c0_i32 : i32, i32
  }
}

</mosaic_0001>

<bundles_post_ra>
// kernel: tpu_custom_call.1
= control target key start
LH: loop header
LB: loop body
LE: loop exit
PB: predicated region body
PF: predicated region fallthrough
CT: control target
= control target key end

     0   :  { %12 = vsyncpa [#allocation3], 0  ;;  %s2168_s0 = inlined_call_operand.hbm [shape: f32[8,16], index: 0, kind: input, shape index: {}]   ;;  %s2169_s1 = inlined_call_operand.hbm [shape: bf16[16,512], index: 1, kind: input, shape index: {}]   ;;  %s2170_s2 = inlined_call_operand.hbm [shape: f32[1,512], index: 2, kind: input, shape index: {}]   ;;  %s2171_s3 = inlined_call_operand.hbm [shape: bf16[512,384], index: 3, kind: input, shape index: {}]   ;;  %s2172_s4 = inlined_call_operand.vmem [shape: f32[1,384], index: 4, kind: input, shape index: {}]   ;;  %s2173_s5 = inlined_call_operand.hbm [shape: bf16[384,128], index: 5, kind: input, shape index: {}]   ;;  %s2174_s6 = inlined_call_operand.vmem [shape: f32[1,128], index: 6, kind: input, shape index: {}]   ;;  %s2175_s7 = inlined_call_operand.hbm [shape: f32[8,128], index: 7, kind: output, shape index: {}]  }
   0x1   :  { %13 = vsyncpa [#allocation6], 0 }
   0x2   :  { %14 = vsyncpa [#allocation9], 0  ;;  %s31_s26 = sshll.u32 %s2169_s1, 4  ;;  %s32_s26 = int_to_ptr.hbm [resolvable:$true] %s31_s26 }
   0x3   :  { %15 = vsyncpa [#allocation4], 0  ;;  %s2056_s27 = smov [#allocation5]   ;;  %s55_s8 = sshll.u32 %s2171_s3, 4  ;;  %s56_s8 = int_to_ptr.hbm [resolvable:$true] %s55_s8 }
   0x4   :  { %s33_s28 = sshll.u32 %s2056_s27, 4  ;;  %s2057_s9 = smov 256   ;;  %s34_s28 = int_to_ptr.vmem [resolvable:$true] %s33_s28 }
   0x5   :  { %s2058_s10 = smov 16   ;;  %s2059_s11 = smov [#allocation8]  }
   0x6   :  { %39 = dma.hbm_to_vmem [thread:$0]  %s32_s26, 512, %s34_s28, [#allocation6], %s2057_s9, %s2057_s9, %s2058_s10  }
   0x7   :  { %s57_s12 = sshll.u32 %s2059_s11, 4  ;;  %s2060_s13 = smov 192   ;;  %s58_s12 = int_to_ptr.vmem [resolvable:$true] %s57_s12 }
   0x8   :  { %s2061_s14 = smov 12   ;;  %s21_s16 = sshll.u32 %s2168_s0, 4  ;;  %s22_s16 = int_to_ptr.hbm [resolvable:$true] %s21_s16 }
   0x9   :  { %63 = dma.hbm_to_vmem [thread:$0]  %s56_s8, 12288, %s58_s12, [#allocation9], %s2060_s13, %s2060_s13, %s2061_s14  }
   0xa   :  { %s2062_s17 = smov [#allocation2]   ;;  %s45_s20 = sshll.u32 %s2170_s2, 4  ;;  %s46_s20 = int_to_ptr.hbm [resolvable:$true] %s45_s20 }
   0xb   :  { %s23_s18 = sshll.u32 %s2062_s17, 4  ;;  %s2063_s21 = smov [#allocation7]   ;;  %s24_s18 = int_to_ptr.vmem [resolvable:$true] %s23_s18 }
   0xc   :  { %26 = dma.hbm_to_vmem [thread:$0]  %s22_s16, 128, %s24_s18, [#allocation3]  }
   0xd   :  { %s47_s22 = sshll.u32 %s2063_s21, 4  ;;  %s70_s25 = sshll.u32 %s2173_s5, 4  ;;  %s48_s22 = int_to_ptr.vmem [resolvable:$true] %s47_s22  ;;  %s71_s25 = int_to_ptr.hbm [resolvable:$true] %s70_s25 }
   0xe   :  { %50 = dma.hbm_to_vmem [thread:$0]  %s46_s20, 64, %s48_s22, [#allocation6]  }
   0xf   :  { %s2064_s0 = smov [#allocation10]   ;;  %s2065_s27 = smov 64  }
  0x10   :  { %s72_s26 = sshll.u32 %s2064_s0, 4  ;;  %s2066_s28 = smov 4   ;;  %s73_s26 = int_to_ptr.vmem [resolvable:$true] %s72_s26 }
  0x11   :  { %78 = dma.hbm_to_vmem [thread:$0]  %s71_s25, 3072, %s73_s26, [#allocation9], %s2065_s27, %s2065_s27, %s2066_s28  }
  0x12   :  { %2048 = dma.done.wait [#allocation3], 128  }
  0x13   :  { %2049 = vsyncadd [#allocation3], 4294967168 }
  0x14   :  { %2050 = dma.done.wait [#allocation6], 576  }
  0x15   :  { %2051 = vsyncadd [#allocation6], 4294966720 }
  0x16   :  { %2052 = dma.done.wait [#allocation9], 15360  }
  0x17   :  { %2053 = vsyncadd [#allocation9], 4294951936  ;;  %v1269_v0 = vld [vmem:[#allocation5] sm:$0xf]  ;;  %v1769_v1 = vld [vmem:[#allocation5 + $0xc] sm:$0xf0] }
  0x18   :  { %v1767_v2 = vld [vmem:[#allocation5 + $0x4] sm:$0xf]  ;;  %v1270_v3 = vor.u32 %v1769_v1, %v1269_v0  ;;  %v1271_v4 = vld [vmem:[#allocation5 + $0x10] sm:$0xf0]  ;;  %v1277_v5 = vld [vmem:[#allocation5 + $0x8] sm:$0xf] }
  0x19   :  { %v1770_v6 = vld [vmem:[#allocation5 + $0x14] sm:$0xf0]  ;;  %v1274_v7 = vor.u32 %v1767_v2, %v1271_v4  ;;  %vm138_vm0 = vcmask 130048   ;;  %v1768_v10 = vld [vmem:[#allocation5 + $0xc] sm:$0xf]  ;;  %s2067_s30 = smov [#allocation11]  }
  0x1a   :  { %v1278_v8 = vor.u32 %v1770_v6, %v1277_v5  ;;  %v102_v9 = vld [vmem:[#allocation2] sm:$0xff]  ;;  %149 = vmatpush.bf16.msra.mxu3 %v1270_v3  ;;  %v1469_v14 = vld [vmem:[#allocation8 + $0x168] sm:$0xf]  ;;  %v1457_v16 = vld [vmem:[#allocation8 + $0x150] sm:$0xf]  ;;  %s1253_s8 = sshll.u32 %s2067_s30, 4  ;;  %s1254_s8 = int_to_ptr.vmem [resolvable:$true] %s1253_s8 }
  0x1b   :  { %v1279_v11 = vld [vmem:[#allocation5 + $0x18] sm:$0xf0]  ;;  %v2123_v12 = vpack.c.bf16 %v102_v9, %v102_v9  ;;  %v1817_v15 = vld [vmem:[#allocation8 + $0x170] sm:$0xf0]  ;;  %162 = vmatpush.bf16.msra.mxu1 %v1274_v7  ;;  %v1814_v18 = vld [vmem:[#allocation8 + $0x158] sm:$0xf0] }
  0x1c   :  { %v1282_v13 = vor.u32 %v1768_v10, %v1279_v11  ;;  %175 = vmatpush.bf16.msra.mxu2 %v1278_v8  ;;  %v1470_v17 = vor.u32 %v1817_v15, %v1469_v14  ;;  %v1373_v19 = vld [vmem:[#allocation8 + $0xa8] sm:$0xf]  ;;  %v1793_v20 = vld [vmem:[#allocation8 + $0xb0] sm:$0xf0]  ;;  %v1458_v24 = vor.u32 %v1814_v18, %v1457_v16  ;;  %v1445_v26 = vld [vmem:[#allocation8 + $0x138] sm:$0xf] }
  0x1d   :  { %v1374_v21 = vor.u32 %v1793_v20, %v1373_v19  ;;  %v1565_v22 = vld [vmem:[#allocation8 + $0x228] sm:$0xf]  ;;  %v1841_v23 = vld [vmem:[#allocation8 + $0x230] sm:$0xf0]  ;;  %1283 = vmatmul.msk.bf16.vlgmr.msra.gmra.mxu3 %vm138_vm0, %v2123_v12  ;;  %v1361_v27 = vld [vmem:[#allocation8 + $0x90] sm:$0xf] }
  0x1e   :  { %188 = vmatpush.bf16.msrb.mxu3 %v1282_v13  ;;  %v1566_v25 = vor.u32 %v1841_v23, %v1565_v22  ;;  %v1790_v28 = vld [vmem:[#allocation8 + $0x98] sm:$0xf0]  ;;  %1284 = vmatmul.msk.bf16.vlgmr.msra.gmra.mxu1 %vm138_vm0, %v2123_v12  ;;  %v1811_v29 = vld [vmem:[#allocation8 + $0x140] sm:$0xf0]  ;;  %v1553_v30 = vld [vmem:[#allocation8 + $0x210] sm:$0xf] }
  0x1f   :  { %863 = vmatpush.bf16.msrb.mxu1 %v1470_v17  ;;  %1285 = vmatmul.msk.bf16.vlgmr.msra.gmra.mxu2 %vm138_vm0, %v2123_v12  ;;  %v1838_v31 = vld [vmem:[#allocation8 + $0x218] sm:$0xf0]  ;;  %v1362_v32 = vor.u32 %v1790_v28, %v1361_v27  ;;  %v1349_v34 = vld [vmem:[#allocation8 + $0x78] sm:$0xf]  ;;  %v1787_v35 = vld [vmem:[#allocation8 + $0x80] sm:$0xf0]  ;;  %v1446_v38 = vor.u32 %v1811_v29, %v1445_v26 }
  0x20   :  { %850 = vmatpush.bf16.msra.mxu0 %v1374_v21  ;;  %876 = vmatpush.bf16.msrb.mxu2 %v1566_v25  ;;  %v1554_v33 = vor.u32 %v1838_v31, %v1553_v30  ;;  %v1541_v36 = vld [vmem:[#allocation8 + $0x1f8] sm:$0xf]  ;;  %v1835_v37 = vld [vmem:[#allocation8 + $0x200] sm:$0xf0]  ;;  %v1433_v39 = vld [vmem:[#allocation8 + $0x120] sm:$0xf]  ;;  %v1350_v41 = vor.u32 %v1787_v35, %v1349_v34 }
  0x21   :  { %v1808_v40 = vld [vmem:[#allocation8 + $0x128] sm:$0xf0]  ;;  %v1542_v42 = vor.u32 %v1835_v37, %v1541_v36  ;;  %v1337_v43 = vld [vmem:[#allocation8 + $0x60] sm:$0xf]  ;;  %v1661_v47 = vld [vmem:[#allocation8 + $0x2e8] sm:$0xf] }
  0x22   :  { %v1784_v44 = vld [vmem:[#allocation8 + $0x68] sm:$0xf0]  ;;  %v1529_v45 = vld [vmem:[#allocation8 + $0x1e0] sm:$0xf]  ;;  %v1434_v48 = vor.u32 %v1808_v40, %v1433_v39  ;;  %v1865_v49 = vld [vmem:[#allocation8 + $0x2f0] sm:$0xf0] }
  0x23   :  { %864 = vmatpush.bf16.msrb.mxu1 %v1458_v24  ;;  %v1832_v46 = vld [vmem:[#allocation8 + $0x1e8] sm:$0xf0]  ;;  %v1421_v50 = vld [vmem:[#allocation8 + $0x108] sm:$0xf]  ;;  %v1805_v51 = vld [vmem:[#allocation8 + $0x110] sm:$0xf0]  ;;  %v1662_v52 = vor.u32 %v1865_v49, %v1661_v47  ;;  %v1338_v53 = vor.u32 %v1784_v44, %v1337_v43 }
  0x24   :  { %851 = vmatpush.bf16.msra.mxu0 %v1362_v32  ;;  %877 = vmatpush.bf16.msrb.mxu2 %v1554_v33  ;;  %v1530_v54 = vor.u32 %v1832_v46, %v1529_v45  ;;  %v1325_v55 = vld [vmem:[#allocation8 + $0x48] sm:$0xf]  ;;  %v1649_v56 = vld [vmem:[#allocation8 + $0x2d0] sm:$0xf]  ;;  %v1862_v57 = vld [vmem:[#allocation8 + $0x2d8] sm:$0xf0]  ;;  %v1422_v62 = vor.u32 %v1805_v51, %v1421_v50 }
  0x25   :  { %v1781_v58 = vld [vmem:[#allocation8 + $0x50] sm:$0xf0]  ;;  %v1517_v59 = vld [vmem:[#allocation8 + $0x1c8] sm:$0xf]  ;;  %889 = vmatpush.bf16.msra.mxu3 %v1662_v52  ;;  %v1650_v61 = vor.u32 %v1862_v57, %v1649_v56  ;;  %v1409_v63 = vld [vmem:[#allocation8 + $0xf0] sm:$0xf] }
  0x26   :  { %v1829_v60 = vld [vmem:[#allocation8 + $0x1d0] sm:$0xf0]  ;;  %v1802_v0 = vld [vmem:[#allocation8 + $0xf8] sm:$0xf0]  ;;  %v1637_v1 = vld [vmem:[#allocation8 + $0x2b8] sm:$0xf]  ;;  %v1326_v2 = vor.u32 %v1781_v58, %v1325_v55 }
  0x27   :  { %865 = vmatpush.bf16.msrb.mxu1 %v1446_v38  ;;  %v1518_v3 = vor.u32 %v1829_v60, %v1517_v59  ;;  %v1313_v4 = vld [vmem:[#allocation8 + $0x30] sm:$0xf]  ;;  %v1859_v5 = vld [vmem:[#allocation8 + $0x2c0] sm:$0xf0]  ;;  %v1778_v6 = vld [vmem:[#allocation8 + $0x38] sm:$0xf0]  ;;  %v1410_v10 = vor.u32 %v1802_v0, %v1409_v63 }
  0x28   :  { %852 = vmatpush.bf16.msra.mxu0 %v1350_v41  ;;  %878 = vmatpush.bf16.msrb.mxu2 %v1542_v42  ;;  %v1505_v7 = vld [vmem:[#allocation8 + $0x1b0] sm:$0xf]  ;;  %v1826_v8 = vld [vmem:[#allocation8 + $0x1b8] sm:$0xf0]  ;;  %v1638_v9 = vor.u32 %v1859_v5, %v1637_v1  ;;  %v1625_v11 = vld [vmem:[#allocation8 + $0x2a0] sm:$0xf]  ;;  %v1314_v16 = vor.u32 %v1778_v6, %v1313_v4 }
  0x29   :  { %890 = vmatpush.bf16.msra.mxu3 %v1650_v61  ;;  %v1856_v13 = vld [vmem:[#allocation8 + $0x2a8] sm:$0xf0]  ;;  %v1397_v14 = vld [vmem:[#allocation8 + $0xd8] sm:$0xf]  ;;  %v1799_v15 = vld [vmem:[#allocation8 + $0xe0] sm:$0xf0]  ;;  %v1506_v17 = vor.u32 %v1826_v8, %v1505_v7 }
  0x2a   :  { %v1301_v18 = vld [vmem:[#allocation8 + $0x18] sm:$0xf]  ;;  %v1775_v19 = vld [vmem:[#allocation8 + $0x20] sm:$0xf0]  ;;  %v1626_v22 = vor.u32 %v1856_v13, %v1625_v11  ;;  %v1398_v23 = vor.u32 %v1799_v15, %v1397_v14  ;;  %v1613_v24 = vld [vmem:[#allocation8 + $0x288] sm:$0xf] }
  0x2b   :  { %866 = vmatpush.bf16.msrb.mxu1 %v1434_v48  ;;  %v1493_v20 = vld [vmem:[#allocation8 + $0x198] sm:$0xf]  ;;  %v1823_v21 = vld [vmem:[#allocation8 + $0x1a0] sm:$0xf0]  ;;  %v1385_v25 = vld [vmem:[#allocation8 + $0xc0] sm:$0xf]  ;;  %v1302_v29 = vor.u32 %v1775_v19, %v1301_v18 }
  0x2c   :  { %853 = vmatpush.bf16.msra.mxu0 %v1338_v53  ;;  %879 = vmatpush.bf16.msrb.mxu2 %v1530_v54  ;;  %v1796_v26 = vld [vmem:[#allocation8 + $0xc8] sm:$0xf0]  ;;  %v1471_v28 = vld [vmem:[#allocation8 + $0x174] sm:$0xf0]  ;;  %v1494_v30 = vor.u32 %v1823_v21, %v1493_v20  ;;  %v1289_v31 = vld [vmem:[#allocation8] sm:$0xf] }
  0x2d   :  { %1286 = vmatmul.msk.bf16.vlgmr.msrb.gmra.mxu3 %vm138_vm0, %v2123_v12  ;;  %v1853_v12 = vld [vmem:[#allocation8 + $0x290] sm:$0xf0]  ;;  %v1816_v27 = vld [vmem:[#allocation8 + $0x16c] sm:$0xf]  ;;  %v1481_v33 = vld [vmem:[#allocation8 + $0x180] sm:$0xf]  ;;  %v1386_v37 = vor.u32 %v1796_v26, %v1385_v25 }
  0x2e   :  { %891 = vmatpush.bf16.msra.mxu3 %v1638_v9  ;;  %v1772_v32 = vld [vmem:[#allocation8 + $0x8] sm:$0xf0]  ;;  %v1614_v36 = vor.u32 %v1853_v12, %v1613_v24  ;;  %v1375_v38 = vld [vmem:[#allocation8 + $0xb4] sm:$0xf0]  ;;  %v1474_v41 = vor.u32 %v1816_v27, %v1471_v28  ;;  %v1601_v42 = vld [vmem:[#allocation8 + $0x270] sm:$0xf] }
  0x2f   :  { %867 = vmatpush.bf16.msrb.mxu1 %v1422_v62  ;;  %v1820_v34 = vld [vmem:[#allocation8 + $0x188] sm:$0xf0]  ;;  %v1567_v40 = vld [vmem:[#allocation8 + $0x234] sm:$0xf0]  ;;  %v1850_v43 = vld [vmem:[#allocation8 + $0x278] sm:$0xf0]  ;;  %v1290_v46 = vor.u32 %v1772_v32, %v1289_v31 }
  0x30   :  { %854 = vmatpush.bf16.msra.mxu0 %v1326_v2  ;;  %880 = vmatpush.bf16.msrb.mxu2 %v1518_v3  ;;  %v1792_v35 = vld [vmem:[#allocation8 + $0xac] sm:$0xf]  ;;  %v1813_v44 = vld [vmem:[#allocation8 + $0x154] sm:$0xf]  ;;  %v1459_v45 = vld [vmem:[#allocation8 + $0x15c] sm:$0xf0]  ;;  %v1482_v47 = vor.u32 %v1820_v34, %v1481_v33  ;;  %v1602_v54 = vor.u32 %v1850_v43, %v1601_v42 }
  0x31   :  { %v1840_v39 = vld [vmem:[#allocation8 + $0x22c] sm:$0xf]  ;;  %v1378_v48 = vor.u32 %v1792_v35, %v1375_v38  ;;  %v1789_v50 = vld [vmem:[#allocation8 + $0x94] sm:$0xf]  ;;  %v1363_v51 = vld [vmem:[#allocation8 + $0x9c] sm:$0xf0]  ;;  %v1462_v55 = vor.u32 %v1813_v44, %v1459_v45 }
  0x32   :  { %892 = vmatpush.bf16.msra.mxu3 %v1626_v22  ;;  %v1570_v49 = vor.u32 %v1840_v39, %v1567_v40  ;;  %v1837_v52 = vld [vmem:[#allocation8 + $0x214] sm:$0xf]  ;;  %v1555_v53 = vld [vmem:[#allocation8 + $0x21c] sm:$0xf0]  ;;  %v1589_v56 = vld [vmem:[#allocation8 + $0x258] sm:$0xf]  ;;  %v1366_v60 = vor.u32 %v1789_v50, %v1363_v51 }
  0x33   :  { %868 = vmatpush.bf16.msrb.mxu1 %v1410_v10  ;;  %v1847_v57 = vld [vmem:[#allocation8 + $0x260] sm:$0xf0]  ;;  %v1810_v58 = vld [vmem:[#allocation8 + $0x13c] sm:$0xf]  ;;  %v1447_v59 = vld [vmem:[#allocation8 + $0x144] sm:$0xf0]  ;;  %v1558_v61 = vor.u32 %v1837_v52, %v1555_v53 }
  0x34   :  { %855 = vmatpush.bf16.msra.mxu0 %v1314_v16  ;;  %881 = vmatpush.bf16.msrb.mxu2 %v1506_v17  ;;  %v1786_v62 = vld [vmem:[#allocation8 + $0x7c] sm:$0xf]  ;;  %v1351_v63 = vld [vmem:[#allocation8 + $0x84] sm:$0xf0]  ;;  %v1590_v2 = vor.u32 %v1847_v57, %v1589_v56  ;;  %v1450_v3 = vor.u32 %v1810_v58, %v1447_v59  ;;  %v1807_v4 = vld [vmem:[#allocation8 + $0x124] sm:$0xf] }
  0x35   :  { %v1834_v0 = vld [vmem:[#allocation8 + $0x1fc] sm:$0xf]  ;;  %v1543_v1 = vld [vmem:[#allocation8 + $0x204] sm:$0xf0]  ;;  %v1435_v5 = vld [vmem:[#allocation8 + $0x12c] sm:$0xf0]  ;;  %v1354_v6 = vor.u32 %v1786_v62, %v1351_v63 }
  0x36   :  { %893 = vmatpush.bf16.msra.mxu3 %v1614_v36  ;;  %v1546_v7 = vor.u32 %v1834_v0, %v1543_v1  ;;  %v1783_v8 = vld [vmem:[#allocation8 + $0x64] sm:$0xf]  ;;  %v1339_v9 = vld [vmem:[#allocation8 + $0x6c] sm:$0xf0]  ;;  %v1438_v13 = vor.u32 %v1807_v4, %v1435_v5  ;;  %v1804_v14 = vld [vmem:[#allocation8 + $0x10c] sm:$0xf] }
  0x37   :  { %869 = vmatpush.bf16.msrb.mxu1 %v1398_v23  ;;  %v1831_v10 = vld [vmem:[#allocation8 + $0x1e4] sm:$0xf]  ;;  %v1531_v11 = vld [vmem:[#allocation8 + $0x1ec] sm:$0xf0]  ;;  %v1423_v15 = vld [vmem:[#allocation8 + $0x114] sm:$0xf0]  ;;  %v1342_v16 = vor.u32 %v1783_v8, %v1339_v9 }
  0x38   :  { %856 = vmatpush.bf16.msra.mxu0 %v1302_v29  ;;  %882 = vmatpush.bf16.msrb.mxu2 %v1494_v30  ;;  %v1534_v17 = vor.u32 %v1831_v10, %v1531_v11  ;;  %v1426_v18 = vor.u32 %v1804_v14, %v1423_v15  ;;  %v1801_v19 = vld [vmem:[#allocation8 + $0xf4] sm:$0xf]  ;;  %v1411_v20 = vld [vmem:[#allocation8 + $0xfc] sm:$0xf0]  ;;  %v1844_v23 = vld [vmem:[#allocation8 + $0x248] sm:$0xf0] }
  0x39   :  { %v1414_v21 = vor.u32 %v1801_v19, %v1411_v20  ;;  %v1577_v22 = vld [vmem:[#allocation8 + $0x240] sm:$0xf]  ;;  %v1780_v12 = vld [vmem:[#allocation8 + $0x4c] sm:$0xf]  ;;  %v1327_v25 = vld [vmem:[#allocation8 + $0x54] sm:$0xf0] }
  0x3a   :  { %894 = vmatpush.bf16.msra.mxu3 %v1602_v54  ;;  %v1578_v24 = vor.u32 %v1844_v23, %v1577_v22  ;;  %v1828_v26 = vld [vmem:[#allocation8 + $0x1cc] sm:$0xf]  ;;  %v1330_v27 = vor.u32 %v1780_v12, %v1327_v25  ;;  %v1519_v28 = vld [vmem:[#allocation8 + $0x1d4] sm:$0xf0]  ;;  %v1798_v33 = vld [vmem:[#allocation8 + $0xdc] sm:$0xf] }
  0x3b   :  { %870 = vmatpush.bf16.msrb.mxu1 %v1386_v37  ;;  %v1864_v29 = vld [vmem:[#allocation8 + $0x2ec] sm:$0xf]  ;;  %v1663_v30 = vld [vmem:[#allocation8 + $0x2f4] sm:$0xf0]  ;;  %v1522_v31 = vor.u32 %v1828_v26, %v1519_v28  ;;  %v1399_v34 = vld [vmem:[#allocation8 + $0xe4] sm:$0xf0] }
  0x3c   :  { %857 = vmatpush.bf16.msra.mxu0 %v1290_v46  ;;  %883 = vmatpush.bf16.msrb.mxu2 %v1482_v47  ;;  %v1666_v32 = vor.u32 %v1864_v29, %v1663_v30  ;;  %v1402_v35 = vor.u32 %v1798_v33, %v1399_v34  ;;  %v1777_v36 = vld [vmem:[#allocation8 + $0x34] sm:$0xf]  ;;  %v1315_v37 = vld [vmem:[#allocation8 + $0x3c] sm:$0xf0]  ;;  %v1795_v45 = vld [vmem:[#allocation8 + $0xc4] sm:$0xf] }
  0x3d   :  { %v1825_v38 = vld [vmem:[#allocation8 + $0x1b4] sm:$0xf]  ;;  %v1318_v39 = vor.u32 %v1777_v36, %v1315_v37  ;;  %v1507_v40 = vld [vmem:[#allocation8 + $0x1bc] sm:$0xf0]  ;;  %v1387_v46 = vld [vmem:[#allocation8 + $0xcc] sm:$0xf0] }
  0x3e   :  { %895 = vmatpush.bf16.msra.mxu3 %v1590_v2  ;;  %v1651_v42 = vld [vmem:[#allocation8 + $0x2dc] sm:$0xf0]  ;;  %v1510_v43 = vor.u32 %v1825_v38, %v1507_v40  ;;  %v1390_v47 = vor.u32 %v1795_v45, %v1387_v46  ;;  %v1822_v50 = vld [vmem:[#allocation8 + $0x19c] sm:$0xf]  ;;  %v1495_v52 = vld [vmem:[#allocation8 + $0x1a4] sm:$0xf0] }
  0x3f   :  { %915 = vmatpush.bf16.msra.mxu1 %v1474_v41  ;;  %v1861_v41 = vld [vmem:[#allocation8 + $0x2d4] sm:$0xf]  ;;  %v1858_v53 = vld [vmem:[#allocation8 + $0x2bc] sm:$0xf]  ;;  %v1639_v54 = vld [vmem:[#allocation8 + $0x2c4] sm:$0xf0] }
  0x40   :  { %902 = vmatpush.bf16.msrb.mxu0 %v1378_v48  ;;  %928 = vmatpush.bf16.msra.mxu2 %v1570_v49  ;;  %v1654_v44 = vor.u32 %v1861_v41, %v1651_v42  ;;  %v1774_v48 = vld [vmem:[#allocation8 + $0x1c] sm:$0xf]  ;;  %v1303_v49 = vld [vmem:[#allocation8 + $0x24] sm:$0xf0]  ;;  %v1642_v56 = vor.u32 %v1858_v53, %v1639_v54  ;;  %v1771_v57 = vld [vmem:[#allocation8 + $0x4] sm:$0xf] }
  0x41   :  { %v1306_v51 = vor.u32 %v1774_v48, %v1303_v49  ;;  %v1291_v58 = vld [vmem:[#allocation8 + $0xc] sm:$0xf0]  ;;  %v1819_v59 = vld [vmem:[#allocation8 + $0x184] sm:$0xf]  ;;  %v1852_v2 = vld [vmem:[#allocation8 + $0x28c] sm:$0xf] }
  0x42   :  { %896 = vmatpush.bf16.msra.mxu3 %v1578_v24  ;;  %v1855_v62 = vld [vmem:[#allocation8 + $0x2a4] sm:$0xf]  ;;  %v1627_v63 = vld [vmem:[#allocation8 + $0x2ac] sm:$0xf0]  ;;  %v1849_v5 = vld [vmem:[#allocation8 + $0x274] sm:$0xf] }
  0x43   :  { %916 = vmatpush.bf16.msra.mxu1 %v1462_v55  ;;  %v1498_v55 = vor.u32 %v1822_v50, %v1495_v52  ;;  %v1630_v1 = vor.u32 %v1855_v62, %v1627_v63  ;;  %v1846_v8 = vld [vmem:[#allocation8 + $0x25c] sm:$0xf]  ;;  %v1591_v9 = vld [vmem:[#allocation8 + $0x264] sm:$0xf0]  ;;  %v1579_v14 = vld [vmem:[#allocation8 + $0x24c] sm:$0xf0] }
  0x44   :  { %903 = vmatpush.bf16.msrb.mxu0 %v1366_v60  ;;  %929 = vmatpush.bf16.msra.mxu2 %v1558_v61  ;;  %v1294_v60 = vor.u32 %v1771_v57, %v1291_v58  ;;  %v1483_v61 = vld [vmem:[#allocation8 + $0x18c] sm:$0xf0]  ;;  %v1594_v10 = vor.u32 %v1846_v8, %v1591_v9  ;;  %v2133_v11 = vld [vmem:[#allocation7] sm:$0xf]  ;;  %v1465_v26 = vld [vmem:[#allocation8 + $0x158] sm:$0xf] }
  0x45   :  { %v1486_v0 = vor.u32 %v1819_v59, %v1483_v61  ;;  %v1477_v19 = vld [vmem:[#allocation8 + $0x170] sm:$0xf]  ;;  %v1818_v20 = vld [vmem:[#allocation8 + $0x178] sm:$0xf0]  ;;  %v112_v23 = vperm.slane %v2133_v11, 2  ;;  %s1255_s11 = sshll.u32 %s2175_s7, 4  ;;  %s1256_s11 = int_to_ptr.hbm [resolvable:$true] %s1255_s11 }
  0x46   :  { %941 = vmatpush.bf16.msrb.mxu3 %v1666_v32  ;;  %v1478_v24 = vor.u32 %v1818_v20, %v1477_v19  ;;  %v1381_v30 = vld [vmem:[#allocation8 + $0xb0] sm:$0xf]  ;;  %v1842_v34 = vld [vmem:[#allocation8 + $0x238] sm:$0xf0]  ;;  %v1453_v40 = vld [vmem:[#allocation8 + $0x140] sm:$0xf] }
  0x47   :  { %917 = vmatpush.bf16.msra.mxu1 %v1450_v3  ;;  %v1615_v3 = vld [vmem:[#allocation8 + $0x294] sm:$0xf0]  ;;  %v1573_v33 = vld [vmem:[#allocation8 + $0x230] sm:$0xf]  ;;  %v1812_v41 = vld [vmem:[#allocation8 + $0x148] sm:$0xf0] }
  0x48   :  { %904 = vmatpush.bf16.msrb.mxu0 %v1354_v6  ;;  %930 = vmatpush.bf16.msra.mxu2 %v1546_v7  ;;  %v1618_v4 = vor.u32 %v1852_v2, %v1615_v3  ;;  %v1603_v6 = vld [vmem:[#allocation8 + $0x27c] sm:$0xf0]  ;;  %v1791_v45 = vld [vmem:[#allocation8 + $0xa0] sm:$0xf0]  ;;  %v1454_v49 = vor.u32 %v1812_v41, %v1453_v40  ;;  %v1441_v52 = vld [vmem:[#allocation8 + $0x128] sm:$0xf] }
  0x49   :  { %v1606_v7 = vor.u32 %v1849_v5, %v1603_v6  ;;  %v1839_v48 = vld [vmem:[#allocation8 + $0x220] sm:$0xf0]  ;;  %v1809_v53 = vld [vmem:[#allocation8 + $0x130] sm:$0xf0]  ;;  %v1788_v57 = vld [vmem:[#allocation8 + $0x88] sm:$0xf0] }
  0x4a   :  { %942 = vmatpush.bf16.msrb.mxu3 %v1654_v44  ;;  %v1369_v44 = vld [vmem:[#allocation8 + $0x98] sm:$0xf]  ;;  %v1549_v58 = vld [vmem:[#allocation8 + $0x200] sm:$0xf]  ;;  %v1836_v59 = vld [vmem:[#allocation8 + $0x208] sm:$0xf0] }
  0x4b   :  { %918 = vmatpush.bf16.msra.mxu1 %v1438_v13  ;;  %v1843_v13 = vld [vmem:[#allocation8 + $0x244] sm:$0xf]  ;;  %v1429_v62 = vld [vmem:[#allocation8 + $0x110] sm:$0xf]  ;;  %v1806_v63 = vld [vmem:[#allocation8 + $0x118] sm:$0xf0] }
  0x4c   :  { %905 = vmatpush.bf16.msrb.mxu0 %v1342_v16  ;;  %931 = vmatpush.bf16.msra.mxu2 %v1534_v17  ;;  %v1582_v15 = vor.u32 %v1843_v13, %v1579_v14  ;;  %v111_v16 = vperm.slane %v2133_v11, 1  ;;  %v1345_v2 = vld [vmem:[#allocation8 + $0x68] sm:$0xf]  ;;  %v1785_v3 = vld [vmem:[#allocation8 + $0x70] sm:$0xf0]  ;;  %v1430_v6 = vor.u32 %v1806_v63, %v1429_v62 }
  0x4d   :  { %v1833_v5 = vld [vmem:[#allocation8 + $0x1f0] sm:$0xf0]  ;;  %v1346_v8 = vor.u32 %v1785_v3, %v1345_v2  ;;  %v1417_v9 = vld [vmem:[#allocation8 + $0xf8] sm:$0xf]  ;;  %v1669_v20 = vld [vmem:[#allocation8 + $0x2f0] sm:$0xf] }
  0x4e   :  { %943 = vmatpush.bf16.msrb.mxu3 %v1642_v56  ;;  %v1357_v56 = vld [vmem:[#allocation8 + $0x80] sm:$0xf]  ;;  %v1621_v62 = vld [vmem:[#allocation8 + $0x290] sm:$0xf]  ;;  %v1854_v63 = vld [vmem:[#allocation8 + $0x298] sm:$0xf0] }
  0x4f   :  { %919 = vmatpush.bf16.msra.mxu1 %v1426_v18  ;;  %v1358_v61 = vor.u32 %v1788_v57, %v1357_v56  ;;  %v1309_v40 = vld [vmem:[#allocation8 + $0x20] sm:$0xf]  ;;  %v1821_v56 = vld [vmem:[#allocation8 + $0x190] sm:$0xf0]  ;;  %v1633_v57 = vld [vmem:[#allocation8 + $0x2a8] sm:$0xf] }
  0x50   :  { %906 = vmatpush.bf16.msrb.mxu0 %v1330_v27  ;;  %932 = vmatpush.bf16.msra.mxu2 %v1522_v31  ;;  %v1815_v27 = vld [vmem:[#allocation8 + $0x160] sm:$0xf0]  ;;  %v1794_v31 = vld [vmem:[#allocation8 + $0xb8] sm:$0xf0] }
  0x51   :  { %v1466_v36 = vor.u32 %v1815_v27, %v1465_v26  ;;  %v1321_v27 = vld [vmem:[#allocation8 + $0x38] sm:$0xf]  ;;  %v1851_v2 = vld [vmem:[#allocation8 + $0x280] sm:$0xf0] }
  0x52   :  { %944 = vmatpush.bf16.msrb.mxu3 %v1630_v1  ;;  %v1550_v1 = vor.u32 %v1836_v59, %v1549_v58  ;;  %v1857_v58 = vld [vmem:[#allocation8 + $0x2b0] sm:$0xf0] }
  0x53   :  { %920 = vmatpush.bf16.msra.mxu1 %v1414_v21  ;;  %v110_v21 = vperm.slane %v2133_v11, 0 }
  0x54   :  { %907 = vmatpush.bf16.msrb.mxu0 %v1318_v39  ;;  %933 = vmatpush.bf16.msra.mxu2 %v1510_v43  ;;  %v1382_v39 = vor.u32 %v1794_v31, %v1381_v30  ;;  %v1574_v43 = vor.u32 %v1842_v34, %v1573_v33  ;;  %v1513_v30 = vld [vmem:[#allocation8 + $0x1b8] sm:$0xf]  ;;  %v1827_v31 = vld [vmem:[#allocation8 + $0x1c0] sm:$0xf0] }
  0x55   :  { %v1657_v33 = vld [vmem:[#allocation8 + $0x2d8] sm:$0xf]  ;;  %v1863_v34 = vld [vmem:[#allocation8 + $0x2e0] sm:$0xf0] }
  0x56   :  { %945 = vmatpush.bf16.msrb.mxu3 %v1618_v4  ;;  %v1537_v4 = vld [vmem:[#allocation8 + $0x1e8] sm:$0xf]  ;;  %v1658_v41 = vor.u32 %v1863_v34, %v1657_v33  ;;  %v1887_v33 = vld [vmem:[#allocation10 + $0xa0] sm:$0xff] }
  0x57   :  { %921 = vmatpush.bf16.msra.mxu1 %v1402_v35  ;;  %v1538_v14 = vor.u32 %v1833_v5, %v1537_v4  ;;  %v1597_v4 = vld [vmem:[#allocation8 + $0x260] sm:$0xf]  ;;  %v1848_v5 = vld [vmem:[#allocation8 + $0x268] sm:$0xf0] }
  0x58   :  { %908 = vmatpush.bf16.msrb.mxu0 %v1306_v51  ;;  %934 = vmatpush.bf16.msra.mxu2 %v1498_v55  ;;  %v1370_v51 = vor.u32 %v1791_v45, %v1369_v44  ;;  %v1501_v44 = vld [vmem:[#allocation8 + $0x1a0] sm:$0xf]  ;;  %v1824_v45 = vld [vmem:[#allocation8 + $0x1a8] sm:$0xf0] }
  0x5a   :  { %946 = vmatpush.bf16.msrb.mxu3 %v1606_v7 }
  0x5b   :  { %922 = vmatpush.bf16.msra.mxu1 %v1390_v47  ;;  %v1561_v47 = vld [vmem:[#allocation8 + $0x218] sm:$0xf] }
  0x5c   :  { %909 = vmatpush.bf16.msrb.mxu0 %v1294_v60  ;;  %935 = vmatpush.bf16.msra.mxu2 %v1486_v0  ;;  %v1562_v54 = vor.u32 %v1839_v48, %v1561_v47  ;;  %v1442_v60 = vor.u32 %v1809_v53, %v1441_v52  ;;  %v113_v0 = vperm.slane %v2133_v11, 3  ;;  %v1525_v11 = vld [vmem:[#allocation8 + $0x1d0] sm:$0xf]  ;;  %v1645_v48 = vld [vmem:[#allocation8 + $0x2c0] sm:$0xf] }
  0x5d   :  { %v1297_v52 = vld [vmem:[#allocation8 + $0x8] sm:$0xf] }
  0x5e   :  { %947 = vmatpush.bf16.msrb.mxu3 %v1594_v10  ;;  %v1803_v10 = vld [vmem:[#allocation8 + $0x100] sm:$0xf0] }
  0x5f   :  { %v1418_v19 = vor.u32 %v1803_v10, %v1417_v9  ;;  %v1874_v9 = vld [vmem:[#allocation10 + $0x38] sm:$0xff]  ;;  %v1873_v10 = vld [vmem:[#allocation10 + $0x30] sm:$0xff] }
  0x62   :  { %948 = vmatpush.bf16.msrb.mxu3 %v1582_v15  ;;  %v1333_v15 = vld [vmem:[#allocation8 + $0x50] sm:$0xf] }
  0x9b   :  { %v164_v17 = vpop.f32.mrf.mxu1 }
  0x9c   :  { %v165_v18 = vadd.f32 %v164_v17, %v111_v16  ;;  %v1782_v16 = vld [vmem:[#allocation8 + $0x58] sm:$0xf0] }
  0x9d   :  { %v1830_v17 = vld [vmem:[#allocation8 + $0x1d8] sm:$0xf0] }
  0x9e   :  { %v195_v22 = vmax.f32 %v165_v18, 0.0  ;;  %v1526_v26 = vor.u32 %v1830_v17, %v1525_v11  ;;  %v1868_v11 = vld [vmem:[#allocation10 + $0x8] sm:$0xff] }
  0x9f   :  { %v1880_v17 = vld [vmem:[#allocation10 + $0x68] sm:$0xff] }
  0xa0   :  { %v2138_v12 = vpack.c.bf16 %v195_v22, %v195_v22  ;;  %v151_v25 = vpop.f32.mrf.mxu3  ;;  %v1405_v22 = vld [vmem:[#allocation8 + $0xe0] sm:$0xf] }
  0xa1   :  { %v152_v28 = vadd.f32 %v151_v25, %v110_v21  ;;  %v1866_v21 = vld [vmem:[#allocation8 + $0x2f8] sm:$0xf0]  ;;  %v1334_v25 = vor.u32 %v1782_v16, %v1333_v15  ;;  %v1869_v15 = vld [vmem:[#allocation10 + $0x10] sm:$0xff] }
  0xa2   :  { %v177_v29 = vpop.f32.mrf.mxu2  ;;  %871 = vmatmul.bf16.vlgmr.msrb.gmra.mxu1 %v2138_v12  ;;  %v1881_v16 = vld [vmem:[#allocation10 + $0x70] sm:$0xff] }
  0xa3   :  { %v178_v32 = vadd.f32 %v177_v29, %v112_v23  ;;  %v194_v35 = vmax.f32 %v152_v28, 0.0  ;;  %967 = vmatpush.bf16.msrb.mxu1 %v1478_v24  ;;  %v166_v37 = vpop.f32.mrf.mxu1  ;;  %v1800_v23 = vld [vmem:[#allocation8 + $0xe8] sm:$0xf0]  ;;  %v1670_v28 = vor.u32 %v1866_v21, %v1669_v20  ;;  %v1779_v29 = vld [vmem:[#allocation8 + $0x40] sm:$0xf0]  ;;  %v1878_v21 = vld [vmem:[#allocation10 + $0x58] sm:$0xff] }
  0xa4   :  { %v1797_v37 = vld [vmem:[#allocation8 + $0xd0] sm:$0xf0] }
  0xa5   :  { %v196_v38 = vmax.f32 %v178_v32, 0.0  ;;  %v2141_v42 = vpack.c.bf16 %v194_v35, %v194_v35  ;;  %v1406_v32 = vor.u32 %v1800_v23, %v1405_v22  ;;  %v1890_v22 = vld [vmem:[#allocation10 + $0xb8] sm:$0xff] }
  0xa7   :  { %v2143_v46 = vpack.c.bf16 %v196_v38, %v196_v38  ;;  %968 = vmatpush.bf16.msrb.mxu1 %v1466_v36  ;;  %858 = vmatmul.bf16.vlgmr.msra.gmra.mxu0 %v2141_v42  ;;  %v1393_v36 = vld [vmem:[#allocation8 + $0xc8] sm:$0xf]  ;;  %v1322_v38 = vor.u32 %v1779_v29, %v1321_v27 }
  0xa8   :  { %v153_v50 = vpop.f32.mrf.mxu3  ;;  %954 = vmatpush.bf16.msra.mxu0 %v1382_v39  ;;  %v1514_v39 = vor.u32 %v1827_v31, %v1513_v30  ;;  %v1394_v47 = vor.u32 %v1797_v37, %v1393_v36  ;;  %v1876_v27 = vld [vmem:[#allocation10 + $0x48] sm:$0xff]  ;;  %v330_v30 = vld [vmem:[%s2172_s4] sm:$0x7]  ;;  %v1886_v36 = vld [vmem:[#allocation10 + $0x98] sm:$0xff] }
  0xa9   :  { %884 = vmatmul.bf16.vlgmr.msrb.gmra.mxu2 %v2143_v46  ;;  %v332_v34 = vperm.slane %v330_v30, 0 }
  0xaa   :  { %980 = vmatpush.bf16.msrb.mxu2 %v1574_v43  ;;  %v179_v55 = vpop.f32.mrf.mxu2  ;;  %v1776_v43 = vld [vmem:[#allocation8 + $0x28] sm:$0xf0] }
  0xab   :  { %969 = vmatpush.bf16.msrb.mxu1 %v1454_v49  ;;  %v1860_v49 = vld [vmem:[#allocation8 + $0x2c8] sm:$0xf0]  ;;  %v1310_v50 = vor.u32 %v1776_v43, %v1309_v40  ;;  %v1489_v55 = vld [vmem:[#allocation8 + $0x188] sm:$0xf] }
  0xac   :  { %955 = vmatpush.bf16.msra.mxu0 %v1370_v51  ;;  %v1502_v51 = vor.u32 %v1824_v45, %v1501_v44  ;;  %v1646_v53 = vor.u32 %v1860_v49, %v1645_v48 }
  0xae   :  { %981 = vmatpush.bf16.msrb.mxu2 %v1562_v54  ;;  %v1773_v54 = vld [vmem:[#allocation8 + $0x10] sm:$0xf0] }
  0xaf   :  { %970 = vmatpush.bf16.msrb.mxu1 %v1442_v60  ;;  %v1298_v59 = vor.u32 %v1773_v54, %v1297_v52  ;;  %v1490_v60 = vor.u32 %v1821_v56, %v1489_v55  ;;  %v1883_v52 = vld [vmem:[#allocation10 + $0x80] sm:$0xff] }
  0xb0   :  { %v190_v7 = vpop.f32.mrf.mxu3  ;;  %956 = vmatpush.bf16.msra.mxu0 %v1358_v61  ;;  %v1634_v61 = vor.u32 %v1857_v58, %v1633_v57 }
  0xb1   :  { %v191_v13 = vadd.f32 %v190_v7, %v113_v0  ;;  %v1622_v0 = vor.u32 %v1854_v63, %v1621_v62  ;;  %v1845_v7 = vld [vmem:[#allocation8 + $0x250] sm:$0xf0] }
  0xb2   :  { %982 = vmatpush.bf16.msrb.mxu2 %v1550_v1  ;;  %923 = vmatmul.bf16.vlgmr.msra.gmra.mxu1 %v2138_v12  ;;  %v1609_v1 = vld [vmem:[#allocation8 + $0x278] sm:$0xf] }
  0xb3   :  { %v197_v18 = vmax.f32 %v191_v13, 0.0  ;;  %971 = vmatpush.bf16.msrb.mxu1 %v1430_v6  ;;  %v1610_v3 = vor.u32 %v1851_v2, %v1609_v1  ;;  %v1585_v6 = vld [vmem:[#allocation8 + $0x248] sm:$0xf]  ;;  %v1870_v13 = vld [vmem:[#allocation10 + $0x18] sm:$0xff] }
  0xb4   :  { %957 = vmatpush.bf16.msra.mxu0 %v1346_v8  ;;  %v1586_v8 = vor.u32 %v1845_v7, %v1585_v6 }
  0xb5   :  { %v2149_v24 = vpack.c.bf16 %v197_v18, %v197_v18  ;;  %v1867_v18 = vld [vmem:[#allocation10] sm:$0xff] }
  0xb6   :  { %983 = vmatpush.bf16.msrb.mxu2 %v1538_v14  ;;  %v1882_v14 = vld [vmem:[#allocation10 + $0x78] sm:$0xff] }
  0xb7   :  { %972 = vmatpush.bf16.msrb.mxu1 %v1418_v19  ;;  %897 = vmatmul.bf16.vlgmr.msra.gmra.mxu3 %v2149_v24  ;;  %v1879_v19 = vld [vmem:[#allocation10 + $0x60] sm:$0xff] }
  0xb8   :  { %910 = vmatmul.bf16.vlgmr.msrb.gmra.mxu0 %v2141_v42  ;;  %v192_v35 = vpop.f32.mrf.mxu3  ;;  %993 = vmatpush.bf16.msra.mxu3 %v1670_v28  ;;  %v1888_v28 = vld [vmem:[#allocation10 + $0xa8] sm:$0xff] }
  0xb9   :  { %936 = vmatmul.bf16.vlgmr.msra.gmra.mxu2 %v2143_v46  ;;  %958 = vmatpush.bf16.msra.mxu0 %v1334_v25  ;;  %v1889_v25 = vld [vmem:[#allocation10 + $0xb0] sm:$0xff] }
  0xba   :  { %984 = vmatpush.bf16.msrb.mxu2 %v1526_v26 }
  0xbb   :  { %973 = vmatpush.bf16.msrb.mxu1 %v1406_v32  ;;  %v1875_v32 = vld [vmem:[#allocation10 + $0x40] sm:$0xff] }
  0xbc   :  { %994 = vmatpush.bf16.msra.mxu3 %v1658_v41 }
  0xbd   :  { %959 = vmatpush.bf16.msra.mxu0 %v1322_v38 }
  0xbe   :  { %985 = vmatpush.bf16.msrb.mxu2 %v1514_v39  ;;  %v1885_v39 = vld [vmem:[#allocation10 + $0x90] sm:$0xff] }
  0xbf   :  { %974 = vmatpush.bf16.msrb.mxu1 %v1394_v47  ;;  %v1884_v47 = vld [vmem:[#allocation10 + $0x88] sm:$0xff] }
  0xc0   :  { %995 = vmatpush.bf16.msra.mxu3 %v1646_v53  ;;  %v333_v53 = vperm.slane %v330_v30, 1 }
  0xc1   :  { %960 = vmatpush.bf16.msra.mxu0 %v1310_v50 }
  0xc2   :  { %986 = vmatpush.bf16.msrb.mxu2 %v1502_v51  ;;  %975 = vmatmul.bf16.vlgmr.msrb.gmra.mxu1 %v2138_v12  ;;  %v1598_v12 = vor.u32 %v1848_v5, %v1597_v4  ;;  %v334_v5 = vperm.slane %v330_v30, 2 }
  0xc3   :  { %1221 = vmatpush.bf16.msra.mxu1 %v1882_v14 }
  0xc4   :  { %996 = vmatpush.bf16.msra.mxu3 %v1634_v61 }
  0xc5   :  { %961 = vmatpush.bf16.msra.mxu0 %v1298_v59 }
  0xc6   :  { %987 = vmatpush.bf16.msrb.mxu2 %v1490_v60 }
  0xc7   :  { %949 = vmatmul.bf16.vlgmr.msrb.gmra.mxu3 %v2149_v24  ;;  %1222 = vmatpush.bf16.msra.mxu1 %v1881_v16 }
  0xc8   :  { %962 = vmatmul.bf16.vlgmr.msra.gmra.mxu0 %v2141_v42  ;;  %997 = vmatpush.bf16.msra.mxu3 %v1622_v0  ;;  %v1872_v42 = vld [vmem:[#allocation10 + $0x28] sm:$0xff] }
  0xc9   :  { %988 = vmatmul.bf16.vlgmr.msrb.gmra.mxu2 %v2143_v46  ;;  %1208 = vmatpush.bf16.msrb.mxu0 %v1874_v9  ;;  %v1871_v46 = vld [vmem:[#allocation10 + $0x20] sm:$0xff] }
  0xca   :  { %1234 = vmatpush.bf16.msra.mxu2 %v1890_v22 }
  0xcb   :  { %1223 = vmatpush.bf16.msra.mxu1 %v1880_v17 }
  0xcc   :  { %998 = vmatpush.bf16.msra.mxu3 %v1610_v3 }
  0xcd   :  { %1209 = vmatpush.bf16.msrb.mxu0 %v1873_v10 }
  0xce   :  { %1235 = vmatpush.bf16.msra.mxu2 %v1889_v25 }
  0xcf   :  { %1224 = vmatpush.bf16.msra.mxu1 %v1879_v19 }
  0xd0   :  { %999 = vmatpush.bf16.msra.mxu3 %v1598_v12 }
  0xd1   :  { %1210 = vmatpush.bf16.msrb.mxu0 %v1872_v42 }
  0xd2   :  { %1236 = vmatpush.bf16.msra.mxu2 %v1888_v28 }
  0xd3   :  { %1225 = vmatpush.bf16.msra.mxu1 %v1878_v21 }
  0xd4   :  { %1000 = vmatpush.bf16.msra.mxu3 %v1586_v8 }
  0xd5   :  { %1211 = vmatpush.bf16.msrb.mxu0 %v1871_v46 }
  0xd6   :  { %1237 = vmatpush.bf16.msra.mxu2 %v1887_v33 }
  0xd7   :  { %1001 = vmatmul.bf16.vlgmr.msra.gmra.mxu3 %v2149_v24  ;;  %v1877_v24 = vld [vmem:[#allocation10 + $0x50] sm:$0xff] }
  0xd8   :  { %1226 = vmatpush.bf16.msra.mxu1 %v1877_v24 }
  0xd9   :  { %1212 = vmatpush.bf16.msrb.mxu0 %v1870_v13 }
  0xda   :  { %1238 = vmatpush.bf16.msra.mxu2 %v1886_v36 }
  0xdc   :  { %1227 = vmatpush.bf16.msra.mxu1 %v1876_v27 }
  0xdd   :  { %1213 = vmatpush.bf16.msrb.mxu0 %v1869_v15 }
  0xde   :  { %1239 = vmatpush.bf16.msra.mxu2 %v1885_v39 }
  0xe0   :  { %1228 = vmatpush.bf16.msra.mxu1 %v1875_v32 }
  0xe1   :  { %1214 = vmatpush.bf16.msrb.mxu0 %v1868_v11 }
  0xe2   :  { %1240 = vmatpush.bf16.msra.mxu2 %v1884_v47 }
  0xe5   :  { %1215 = vmatpush.bf16.msrb.mxu0 %v1867_v18  ;;  %v1903_v18 = vld [vmem:[%s2174_s6] ss:$0 sm:$0xff] }
  0xe6   :  { %1241 = vmatpush.bf16.msra.mxu2 %v1883_v52 }
 0x11f   :  { %v872_v20 = vpop.f32.mrf.mxu1 }
 0x124   :  { %v859_v23 = vpop.f32.mrf.mxu0 }
 0x125   :  { %v860_v37 = vadd.f32 %v859_v23, %v332_v34 }
 0x127   :  { %v874_v26 = vpop.f32.mrf.mxu1  ;;  %v873_v41 = vadd.f32 %v872_v20, %v860_v37 }
 0x12c   :  { %v885_v29 = vpop.f32.mrf.mxu2  ;;  %v861_v31 = vpop.f32.mrf.mxu0 }
 0x12d   :  { %v886_v44 = vadd.f32 %v885_v29, %v873_v41 }
 0x12f   :  { %v924_v35 = vpop.f32.mrf.mxu1 }
 0x134   :  { %v887_v38 = vpop.f32.mrf.mxu2 }
 0x135   :  { %v911_v40 = vpop.f32.mrf.mxu0 }
 0x136   :  { %v912_v57 = vadd.f32 %v911_v40, %v333_v53 }
 0x137   :  { %v926_v43 = vpop.f32.mrf.mxu1 }
 0x138   :  { %v925_v60 = vadd.f32 %v924_v35, %v912_v57 }
 0x13a   :  { %v898_v45 = vpop.f32.mrf.mxu3 }
 0x13b   :  { %v899_v48 = vadd.f32 %v898_v45, %v886_v44 }
 0x13c   :  { %v937_v49 = vpop.f32.mrf.mxu2 }
 0x13d   :  { %v1006_v50 = vmax.f32 %v899_v48, 0.0  ;;  %v913_v51 = vpop.f32.mrf.mxu0  ;;  %v938_v62 = vadd.f32 %v937_v49, %v925_v60 }
 0x13f   :  { %v1009_v54 = vpack.c.bf16 %v1006_v50, %v1006_v50  ;;  %v976_v55 = vpop.f32.mrf.mxu1 }
 0x141   :  { %1216 = vmatmul.bf16.vlgmr.msrb.gmra.mxu0 %v1009_v54 }
 0x142   :  { %v900_v56 = vpop.f32.mrf.mxu3 }
 0x144   :  { %v939_v58 = vpop.f32.mrf.mxu2 }
 0x145   :  { %v963_v59 = vpop.f32.mrf.mxu0 }
 0x146   :  { %v964_v7 = vadd.f32 %v963_v59, %v334_v5 }
 0x147   :  { %v978_v61 = vpop.f32.mrf.mxu1 }
 0x148   :  { %v977_v8 = vadd.f32 %v976_v55, %v964_v7 }
 0x14a   :  { %v950_v63 = vpop.f32.mrf.mxu3 }
 0x14b   :  { %v951_v0 = vadd.f32 %v950_v63, %v938_v62 }
 0x14c   :  { %v989_v1 = vpop.f32.mrf.mxu2 }
 0x14d   :  { %v1007_v2 = vmax.f32 %v951_v0, 0.0  ;;  %v965_v3 = vpop.f32.mrf.mxu0  ;;  %v990_v9 = vadd.f32 %v989_v1, %v977_v8 }
 0x14f   :  { %v1010_v4 = vpack.c.bf16 %v1007_v2, %v1007_v2 }
 0x151   :  { %1229 = vmatmul.bf16.vlgmr.msra.gmra.mxu1 %v1010_v4 }
 0x152   :  { %v952_v12 = vpop.f32.mrf.mxu3 }
 0x154   :  { %v991_v6 = vpop.f32.mrf.mxu2 }
 0x15a   :  { %v1002_v10 = vpop.f32.mrf.mxu3 }
 0x15b   :  { %v1003_v42 = vadd.f32 %v1002_v10, %v990_v9 }
 0x15d   :  { %v1008_v46 = vmax.f32 %v1003_v42, 0.0 }
 0x15f   :  { %v1011_v13 = vpack.c.bf16 %v1008_v46, %v1008_v46 }
 0x161   :  { %1242 = vmatmul.bf16.vlgmr.msra.gmra.mxu2 %v1011_v13 }
 0x162   :  { %v1004_v14 = vpop.f32.mrf.mxu3 }
 0x1be   :  { %v1217_v15 = vpop.f32.mrf.mxu0 }
 0x1bf   :  { %v1218_v19 = vadd.f32 %v1903_v18, %v1217_v15 }
 0x1c6   :  { %v1219_v16 = vpop.f32.mrf.mxu0 }
 0x1ce   :  { %v1230_v11 = vpop.f32.mrf.mxu1 }
 0x1cf   :  { %v1231_v20 = vadd.f32 %v1230_v11, %v1218_v19 }
 0x1d6   :  { %v1232_v17 = vpop.f32.mrf.mxu1 }
 0x1e4   :  { %v1243_v21 = vpop.f32.mrf.mxu2 }
 0x1e5   :  { %v1244_v22 = vadd.f32 %v1243_v21, %v1231_v20 }
 0x1e7   :  { %1247 = vst [vmem:[#allocation11] sm:$0xff] %v1244_v22 }
 0x1e8   :  { %1258 = dma.vmem_to_hbm [thread:$0]  %s1254_s8, 128, %s1256_s11, [#allocation4]  }
 0x1ec   :  { %v1245_v23 = vpop.f32.mrf.mxu2 }
 0x1ed   :  { %2054 = dma.done.wait [#allocation4], 128  }
 0x1ee   :  { %2055 = vsyncadd [#allocation4], 4294967168 }
 0x1ef   :  { %1263 = vsyncpa [#allocation3], 1 }
 0x1f0   :  { %1264 = vsyncpa [#allocation6], 1 }
 0x1f1   :  { %1265 = vsyncpa [#allocation9], 1 }
 0x1f2   :  { %1266 = vsyncpa [#allocation4], 1 }

// kernel: tpu_custom_call.1
= control target key start
LH: loop header
LB: loop body
LE: loop exit
PB: predicated region body
PF: predicated region fallthrough
CT: control target
= control target key end

     0   :  { %12 = vsyncpa [#allocation3], 0  ;;  %s2168_s0 = inlined_call_operand.hbm [shape: f32[8,16], index: 0, kind: input, shape index: {}]   ;;  %s2169_s1 = inlined_call_operand.hbm [shape: bf16[16,512], index: 1, kind: input, shape index: {}]   ;;  %s2170_s2 = inlined_call_operand.hbm [shape: f32[1,512], index: 2, kind: input, shape index: {}]   ;;  %s2171_s3 = inlined_call_operand.hbm [shape: bf16[512,384], index: 3, kind: input, shape index: {}]   ;;  %s2172_s4 = inlined_call_operand.vmem [shape: f32[1,384], index: 4, kind: input, shape index: {}]   ;;  %s2173_s5 = inlined_call_operand.hbm [shape: bf16[384,128], index: 5, kind: input, shape index: {}]   ;;  %s2174_s6 = inlined_call_operand.vmem [shape: f32[1,128], index: 6, kind: input, shape index: {}]   ;;  %s2175_s7 = inlined_call_operand.hbm [shape: f32[8,128], index: 7, kind: output, shape index: {}]  }
   0x1   :  { %13 = vsyncpa [#allocation6], 0 }
   0x2   :  { %14 = vsyncpa [#allocation9], 0  ;;  %s31_s26 = sshll.u32 %s2169_s1, 4  ;;  %s32_s26 = int_to_ptr.hbm [resolvable:$true] %s31_s26 }
   0x3   :  { %15 = vsyncpa [#allocation4], 0  ;;  %s2056_s27 = smov [#allocation5]   ;;  %s55_s8 = sshll.u32 %s2171_s3, 4  ;;  %s56_s8 = int_to_ptr.hbm [resolvable:$true] %s55_s8 }
   0x4   :  { %s33_s28 = sshll.u32 %s2056_s27, 4  ;;  %s2057_s9 = smov 256   ;;  %s34_s28 = int_to_ptr.vmem [resolvable:$true] %s33_s28 }
   0x5   :  { %s2058_s10 = smov 16   ;;  %s2059_s11 = smov [#allocation8]  }
   0x6   :  { %39 = dma.hbm_to_vmem [thread:$0]  %s32_s26, 512, %s34_s28, [#allocation6], %s2057_s9, %s2057_s9, %s2058_s10  }
   0x7   :  { %s57_s12 = sshll.u32 %s2059_s11, 4  ;;  %s2060_s13 = smov 192   ;;  %s58_s12 = int_to_ptr.vmem [resolvable:$true] %s57_s12 }
   0x8   :  { %s2061_s14 = smov 12   ;;  %s21_s16 = sshll.u32 %s2168_s0, 4  ;;  %s22_s16 = int_to_ptr.hbm [resolvable:$true] %s21_s16 }
   0x9   :  { %63 = dma.hbm_to_vmem [thread:$0]  %s56_s8, 12288, %s58_s12, [#allocation9], %s2060_s13, %s2060_s13, %s2061_s14  }
   0xa   :  { %s2062_s17 = smov [#allocation2]   ;;  %s45_s20 = sshll.u32 %s2170_s2, 4  ;;  %s46_s20 = int_to_ptr.hbm [resolvable:$true] %s45_s20 }
   0xb   :  { %s23_s18 = sshll.u32 %s2062_s17, 4  ;;  %s2063_s21 = smov [#allocation7]   ;;  %s24_s18 = int_to_ptr.vmem [resolvable:$true] %s23_s18 }
   0xc   :  { %26 = dma.hbm_to_vmem [thread:$0]  %s22_s16, 128, %s24_s18, [#allocation3]  }
   0xd   :  { %s47_s22 = sshll.u32 %s2063_s21, 4  ;;  %s70_s25 = sshll.u32 %s2173_s5, 4  ;;  %s48_s22 = int_to_ptr.vmem [resolvable:$true] %s47_s22  ;;  %s71_s25 = int_to_ptr.hbm [resolvable:$true] %s70_s25 }
   0xe   :  { %50 = dma.hbm_to_vmem [thread:$0]  %s46_s20, 64, %s48_s22, [#allocation6]  }
   0xf   :  { %s2064_s0 = smov [#allocation10]   ;;  %s2065_s27 = smov 64  }
  0x10   :  { %s72_s26 = sshll.u32 %s2064_s0, 4  ;;  %s2066_s28 = smov 4   ;;  %s73_s26 = int_to_ptr.vmem [resolvable:$true] %s72_s26 }
  0x11   :  { %78 = dma.hbm_to_vmem [thread:$0]  %s71_s25, 3072, %s73_s26, [#allocation9], %s2065_s27, %s2065_s27, %s2066_s28  }
  0x12   :  { %2048 = dma.done.wait [#allocation3], 128  }
  0x13   :  { %2049 = vsyncadd [#allocation3], 4294967168 }
  0x14   :  { %2050 = dma.done.wait [#allocation6], 576  }
  0x15   :  { %2051 = vsyncadd [#allocation6], 4294966720 }
  0x16   :  { %2052 = dma.done.wait [#allocation9], 15360  }
  0x17   :  { %2053 = vsyncadd [#allocation9], 4294951936  ;;  %v1269_v0 = vld [vmem:[#allocation5] sm:$0xf]  ;;  %v1769_v1 = vld [vmem:[#allocation5 + $0xc] sm:$0xf0] }
  0x18   :  { %v1767_v2 = vld [vmem:[#allocation5 + $0x4] sm:$0xf]  ;;  %v1270_v3 = vor.u32 %v1769_v1, %v1269_v0  ;;  %v1271_v4 = vld [vmem:[#allocation5 + $0x10] sm:$0xf0]  ;;  %v1277_v5 = vld [vmem:[#allocation5 + $0x8] sm:$0xf] }
  0x19   :  { %v1770_v6 = vld [vmem:[#allocation5 + $0x14] sm:$0xf0]  ;;  %v1274_v7 = vor.u32 %v1767_v2, %v1271_v4  ;;  %vm138_vm0 = vcmask 130048   ;;  %v1768_v10 = vld [vmem:[#allocation5 + $0xc] sm:$0xf]  ;;  %s2067_s30 = smov [#allocation11]  }
  0x1a   :  { %v1278_v8 = vor.u32 %v1770_v6, %v1277_v5  ;;  %v102_v9 = vld [vmem:[#allocation2] sm:$0xff]  ;;  %149 = vmatpush.bf16.msra.mxu3 %v1270_v3  ;;  %v1469_v14 = vld [vmem:[#allocation8 + $0x168] sm:$0xf]  ;;  %v1457_v16 = vld [vmem:[#allocation8 + $0x150] sm:$0xf]  ;;  %s1253_s8 = sshll.u32 %s2067_s30, 4  ;;  %s1254_s8 = int_to_ptr.vmem [resolvable:$true] %s1253_s8 }
  0x1b   :  { %v1279_v11 = vld [vmem:[#allocation5 + $0x18] sm:$0xf0]  ;;  %v2123_v12 = vpack.c.bf16 %v102_v9, %v102_v9  ;;  %v1817_v15 = vld [vmem:[#allocation8 + $0x170] sm:$0xf0]  ;;  %162 = vmatpush.bf16.msra.mxu1 %v1274_v7  ;;  %v1814_v18 = vld [vmem:[#allocation8 + $0x158] sm:$0xf0] }
  0x1c   :  { %v1282_v13 = vor.u32 %v1768_v10, %v1279_v11  ;;  %175 = vmatpush.bf16.msra.mxu2 %v1278_v8  ;;  %v1470_v17 = vor.u32 %v1817_v15, %v1469_v14  ;;  %v1373_v19 = vld [vmem:[#allocation8 + $0xa8] sm:$0xf]  ;;  %v1793_v20 = vld [vmem:[#allocation8 + $0xb0] sm:$0xf0]  ;;  %v1458_v24 = vor.u32 %v1814_v18, %v1457_v16  ;;  %v1445_v26 = vld [vmem:[#allocation8 + $0x138] sm:$0xf] }
  0x1d   :  { %v1374_v21 = vor.u32 %v1793_v20, %v1373_v19  ;;  %v1565_v22 = vld [vmem:[#allocation8 + $0x228] sm:$0xf]  ;;  %v1841_v23 = vld [vmem:[#allocation8 + $0x230] sm:$0xf0]  ;;  %1283 = vmatmul.msk.bf16.vlgmr.msra.gmra.mxu3 %vm138_vm0, %v2123_v12  ;;  %v1361_v27 = vld [vmem:[#allocation8 + $0x90] sm:$0xf] }
  0x1e   :  { %188 = vmatpush.bf16.msrb.mxu3 %v1282_v13  ;;  %v1566_v25 = vor.u32 %v1841_v23, %v1565_v22  ;;  %v1790_v28 = vld [vmem:[#allocation8 + $0x98] sm:$0xf0]  ;;  %1284 = vmatmul.msk.bf16.vlgmr.msra.gmra.mxu1 %vm138_vm0, %v2123_v12  ;;  %v1811_v29 = vld [vmem:[#allocation8 + $0x140] sm:$0xf0]  ;;  %v1553_v30 = vld [vmem:[#allocation8 + $0x210] sm:$0xf] }
  0x1f   :  { %863 = vmatpush.bf16.msrb.mxu1 %v1470_v17  ;;  %1285 = vmatmul.msk.bf16.vlgmr.msra.gmra.mxu2 %vm138_vm0, %v2123_v12  ;;  %v1838_v31 = vld [vmem:[#allocation8 + $0x218] sm:$0xf0]  ;;  %v1362_v32 = vor.u32 %v1790_v28, %v1361_v27  ;;  %v1349_v34 = vld [vmem:[#allocation8 + $0x78] sm:$0xf]  ;;  %v1787_v35 = vld [vmem:[#allocation8 + $0x80] sm:$0xf0]  ;;  %v1446_v38 = vor.u32 %v1811_v29, %v1445_v26 }
  0x20   :  { %850 = vmatpush.bf16.msra.mxu0 %v1374_v21  ;;  %876 = vmatpush.bf16.msrb.mxu2 %v1566_v25  ;;  %v1554_v33 = vor.u32 %v1838_v31, %v1553_v30  ;;  %v1541_v36 = vld [vmem:[#allocation8 + $0x1f8] sm:$0xf]  ;;  %v1835_v37 = vld [vmem:[#allocation8 + $0x200] sm:$0xf0]  ;;  %v1433_v39 = vld [vmem:[#allocation8 + $0x120] sm:$0xf]  ;;  %v1350_v41 = vor.u32 %v1787_v35, %v1349_v34 }
  0x21   :  { %v1808_v40 = vld [vmem:[#allocation8 + $0x128] sm:$0xf0]  ;;  %v1542_v42 = vor.u32 %v1835_v37, %v1541_v36  ;;  %v1337_v43 = vld [vmem:[#allocation8 + $0x60] sm:$0xf]  ;;  %v1661_v47 = vld [vmem:[#allocation8 + $0x2e8] sm:$0xf] }
  0x22   :  { %v1784_v44 = vld [vmem:[#allocation8 + $0x68] sm:$0xf0]  ;;  %v1529_v45 = vld [vmem:[#allocation8 + $0x1e0] sm:$0xf]  ;;  %v1434_v48 = vor.u32 %v1808_v40, %v1433_v39  ;;  %v1865_v49 = vld [vmem:[#allocation8 + $0x2f0] sm:$0xf0] }
  0x23   :  { %864 = vmatpush.bf16.msrb.mxu1 %v1458_v24  ;;  %v1832_v46 = vld [vmem:[#allocation8 + $0x1e8] sm:$0xf0]  ;;  %v1421_v50 = vld [vmem:[#allocation8 + $0x108] sm:$0xf]  ;;  %v1805_v51 = vld [vmem:[#allocation8 + $0x110] sm:$0xf0]  ;;  %v1662_v52 = vor.u32 %v1865_v49, %v1661_v47  ;;  %v1338_v53 = vor.u32 %v1784_v44, %v1337_v43 }
  0x24   :  { %851 = vmatpush.bf16.msra.mxu0 %v1362_v32  ;;  %877 = vmatpush.bf16.msrb.mxu2 %v1554_v33  ;;  %v1530_v54 = vor.u32 %v1832_v46, %v1529_v45  ;;  %v1325_v55 = vld [vmem:[#allocation8 + $0x48] sm:$0xf]  ;;  %v1649_v56 = vld [vmem:[#allocation8 + $0x2d0] sm:$0xf]  ;;  %v1862_v57 = vld [vmem:[#allocation8 + $0x2d8] sm:$0xf0]  ;;  %v1422_v62 = vor.u32 %v1805_v51, %v1421_v50 }
  0x25   :  { %v1781_v58 = vld [vmem:[#allocation8 + $0x50] sm:$0xf0]  ;;  %v1517_v59 = vld [vmem:[#allocation8 + $0x1c8] sm:$0xf]  ;;  %889 = vmatpush.bf16.msra.mxu3 %v1662_v52  ;;  %v1650_v61 = vor.u32 %v1862_v57, %v1649_v56  ;;  %v1409_v63 = vld [vmem:[#allocation8 + $0xf0] sm:$0xf] }
  0x26   :  { %v1829_v60 = vld [vmem:[#allocation8 + $0x1d0] sm:$0xf0]  ;;  %v1802_v0 = vld [vmem:[#allocation8 + $0xf8] sm:$0xf0]  ;;  %v1637_v1 = vld [vmem:[#allocation8 + $0x2b8] sm:$0xf]  ;;  %v1326_v2 = vor.u32 %v1781_v58, %v1325_v55 }
  0x27   :  { %865 = vmatpush.bf16.msrb.mxu1 %v1446_v38  ;;  %v1518_v3 = vor.u32 %v1829_v60, %v1517_v59  ;;  %v1313_v4 = vld [vmem:[#allocation8 + $0x30] sm:$0xf]  ;;  %v1859_v5 = vld [vmem:[#allocation8 + $0x2c0] sm:$0xf0]  ;;  %v1778_v6 = vld [vmem:[#allocation8 + $0x38] sm:$0xf0]  ;;  %v1410_v10 = vor.u32 %v1802_v0, %v1409_v63 }
  0x28   :  { %852 = vmatpush.bf16.msra.mxu0 %v1350_v41  ;;  %878 = vmatpush.bf16.msrb.mxu2 %v1542_v42  ;;  %v1505_v7 = vld [vmem:[#allocation8 + $0x1b0] sm:$0xf]  ;;  %v1826_v8 = vld [vmem:[#allocation8 + $0x1b8] sm:$0xf0]  ;;  %v1638_v9 = vor.u32 %v1859_v5, %v1637_v1  ;;  %v1625_v11 = vld [vmem:[#allocation8 + $0x2a0] sm:$0xf]  ;;  %v1314_v16 = vor.u32 %v1778_v6, %v1313_v4 }
  0x29   :  { %890 = vmatpush.bf16.msra.mxu3 %v1650_v61  ;;  %v1856_v13 = vld [vmem:[#allocation8 + $0x2a8] sm:$0xf0]  ;;  %v1397_v14 = vld [vmem:[#allocation8 + $0xd8] sm:$0xf]  ;;  %v1799_v15 = vld [vmem:[#allocation8 + $0xe0] sm:$0xf0]  ;;  %v1506_v17 = vor.u32 %v1826_v8, %v1505_v7 }
  0x2a   :  { %v1301_v18 = vld [vmem:[#allocation8 + $0x18] sm:$0xf]  ;;  %v1775_v19 = vld [vmem:[#allocation8 + $0x20] sm:$0xf0]  ;;  %v1626_v22 = vor.u32 %v1856_v13, %v1625_v11  ;;  %v1398_v23 = vor.u32 %v1799_v15, %v1397_v14  ;;  %v1613_v24 = vld [vmem:[#allocation8 + $0x288] sm:$0xf] }
  0x2b   :  { %866 = vmatpush.bf16.msrb.mxu1 %v1434_v48  ;;  %v1493_v20 = vld [vmem:[#allocation8 + $0x198] sm:$0xf]  ;;  %v1823_v21 = vld [vmem:[#allocation8 + $0x1a0] sm:$0xf0]  ;;  %v1385_v25 = vld [vmem:[#allocation8 + $0xc0] sm:$0xf]  ;;  %v1302_v29 = vor.u32 %v1775_v19, %v1301_v18 }
  0x2c   :  { %853 = vmatpush.bf16.msra.mxu0 %v1338_v53  ;;  %879 = vmatpush.bf16.msrb.mxu2 %v1530_v54  ;;  %v1796_v26 = vld [vmem:[#allocation8 + $0xc8] sm:$0xf0]  ;;  %v1471_v28 = vld [vmem:[#allocation8 + $0x174] sm:$0xf0]  ;;  %v1494_v30 = vor.u32 %v1823_v21, %v1493_v20  ;;  %v1289_v31 = vld [vmem:[#allocation8] sm:$0xf] }
  0x2d   :  { %1286 = vmatmul.msk.bf16.vlgmr.msrb.gmra.mxu3 %vm138_vm0, %v2123_v12  ;;  %v1853_v12 = vld [vmem:[#allocation8 + $0x290] sm:$0xf0]  ;;  %v1816_v27 = vld [vmem:[#allocation8 + $0x16c] sm:$0xf]  ;;  %v1481_v33 = vld [vmem:[#allocation8 + $0x180] sm:$0xf]  ;;  %v1386_v37 = vor.u32 %v1796_v26, %v1385_v25 }
  0x2e   :  { %891 = vmatpush.bf16.msra.mxu3 %v1638_v9  ;;  %v1772_v32 = vld [vmem:[#allocation8 + $0x8] sm:$0xf0]  ;;  %v1614_v36 = vor.u32 %v1853_v12, %v1613_v24  ;;  %v1375_v38 = vld [vmem:[#allocation8 + $0xb4] sm:$0xf0]  ;;  %v1474_v41 = vor.u32 %v1816_v27, %v1471_v28  ;;  %v1601_v42 = vld [vmem:[#allocation8 + $0x270] sm:$0xf] }
  0x2f   :  { %867 = vmatpush.bf16.msrb.mxu1 %v1422_v62  ;;  %v1820_v34 = vld [vmem:[#allocation8 + $0x188] sm:$0xf0]  ;;  %v1567_v40 = vld [vmem:[#allocation8 + $0x234] sm:$0xf0]  ;;  %v1850_v43 = vld [vmem:[#allocation8 + $0x278] sm:$0xf0]  ;;  %v1290_v46 = vor.u32 %v1772_v32, %v1289_v31 }
  0x30   :  { %854 = vmatpush.bf16.msra.mxu0 %v1326_v2  ;;  %880 = vmatpush.bf16.msrb.mxu2 %v1518_v3  ;;  %v1792_v35 = vld [vmem:[#allocation8 + $0xac] sm:$0xf]  ;;  %v1813_v44 = vld [vmem:[#allocation8 + $0x154] sm:$0xf]  ;;  %v1459_v45 = vld [vmem:[#allocation8 + $0x15c] sm:$0xf0]  ;;  %v1482_v47 = vor.u32 %v1820_v34, %v1481_v33  ;;  %v1602_v54 = vor.u32 %v1850_v43, %v1601_v42 }
  0x31   :  { %v1840_v39 = vld [vmem:[#allocation8 + $0x22c] sm:$0xf]  ;;  %v1378_v48 = vor.u32 %v1792_v35, %v1375_v38  ;;  %v1789_v50 = vld [vmem:[#allocation8 + $0x94] sm:$0xf]  ;;  %v1363_v51 = vld [vmem:[#allocation8 + $0x9c] sm:$0xf0]  ;;  %v1462_v55 = vor.u32 %v1813_v44, %v1459_v45 }
  0x32   :  { %892 = vmatpush.bf16.msra.mxu3 %v1626_v22  ;;  %v1570_v49 = vor.u32 %v1840_v39, %v1567_v40  ;;  %v1837_v52 = vld [vmem:[#allocation8 + $0x214] sm:$0xf]  ;;  %v1555_v53 = vld [vmem:[#allocation8 + $0x21c] sm:$0xf0]  ;;  %v1589_v56 = vld [vmem:[#allocation8 + $0x258] sm:$0xf]  ;;  %v1366_v60 = vor.u32 %v1789_v50, %v1363_v51 }
  0x33   :  { %868 = vmatpush.bf16.msrb.mxu1 %v1410_v10  ;;  %v1847_v57 = vld [vmem:[#allocation8 + $0x260] sm:$0xf0]  ;;  %v1810_v58 = vld [vmem:[#allocation8 + $0x13c] sm:$0xf]  ;;  %v1447_v59 = vld [vmem:[#allocation8 + $0x144] sm:$0xf0]  ;;  %v1558_v61 = vor.u32 %v1837_v52, %v1555_v53 }
  0x34   :  { %855 = vmatpush.bf16.msra.mxu0 %v1314_v16  ;;  %881 = vmatpush.bf16.msrb.mxu2 %v1506_v17  ;;  %v1786_v62 = vld [vmem:[#allocation8 + $0x7c] sm:$0xf]  ;;  %v1351_v63 = vld [vmem:[#allocation8 + $0x84] sm:$0xf0]  ;;  %v1590_v2 = vor.u32 %v1847_v57, %v1589_v56  ;;  %v1450_v3 = vor.u32 %v1810_v58, %v1447_v59  ;;  %v1807_v4 = vld [vmem:[#allocation8 + $0x124] sm:$0xf] }
  0x35   :  { %v1834_v0 = vld [vmem:[#allocation8 + $0x1fc] sm:$0xf]  ;;  %v1543_v1 = vld [vmem:[#allocation8 + $0x204] sm:$0xf0]  ;;  %v1435_v5 = vld [vmem:[#allocation8 + $0x12c] sm:$0xf0]  ;;  %v1354_v6 = vor.u32 %v1786_v62, %v1351_v63 }
  0x36   :  { %893 = vmatpush.bf16.msra.mxu3 %v1614_v36  ;;  %v1546_v7 = vor.u32 %v1834_v0, %v1543_v1  ;;  %v1783_v8 = vld [vmem:[#allocation8 + $0x64] sm:$0xf]  ;;  %v1339_v9 = vld [vmem:[#allocation8 + $0x6c] sm:$0xf0]  ;;  %v1438_v13 = vor.u32 %v1807_v4, %v1435_v5  ;;  %v1804_v14 = vld [vmem:[#allocation8 + $0x10c] sm:$0xf] }
  0x37   :  { %869 = vmatpush.bf16.msrb.mxu1 %v1398_v23  ;;  %v1831_v10 = vld [vmem:[#allocation8 + $0x1e4] sm:$0xf]  ;;  %v1531_v11 = vld [vmem:[#allocation8 + $0x1ec] sm:$0xf0]  ;;  %v1423_v15 = vld [vmem:[#allocation8 + $0x114] sm:$0xf0]  ;;  %v1342_v16 = vor.u32 %v1783_v8, %v1339_v9 }
  0x38   :  { %856 = vmatpush.bf16.msra.mxu0 %v1302_v29  ;;  %882 = vmatpush.bf16.msrb.mxu2 %v1494_v30  ;;  %v1534_v17 = vor.u32 %v1831_v10, %v1531_v11  ;;  %v1426_v18 = vor.u32 %v1804_v14, %v1423_v15  ;;  %v1801_v19 = vld [vmem:[#allocation8 + $0xf4] sm:$0xf]  ;;  %v1411_v20 = vld [vmem:[#allocation8 + $0xfc] sm:$0xf0]  ;;  %v1844_v23 = vld [vmem:[#allocation8 + $0x248] sm:$0xf0] }
  0x39   :  { %v1414_v21 = vor.u32 %v1801_v19, %v1411_v20  ;;  %v1577_v22 = vld [vmem:[#allocation8 + $0x240] sm:$0xf]  ;;  %v1780_v12 = vld [vmem:[#allocation8 + $0x4c] sm:$0xf]  ;;  %v1327_v25 = vld [vmem:[#allocation8 + $0x54] sm:$0xf0] }
  0x3a   :  { %894 = vmatpush.bf16.msra.mxu3 %v1602_v54  ;;  %v1578_v24 = vor.u32 %v1844_v23, %v1577_v22  ;;  %v1828_v26 = vld [vmem:[#allocation8 + $0x1cc] sm:$0xf]  ;;  %v1330_v27 = vor.u32 %v1780_v12, %v1327_v25  ;;  %v1519_v28 = vld [vmem:[#allocation8 + $0x1d4] sm:$0xf0]  ;;  %v1798_v33 = vld [vmem:[#allocation8 + $0xdc] sm:$0xf] }
  0x3b   :  { %870 = vmatpush.bf16.msrb.mxu1 %v1386_v37  ;;  %v1864_v29 = vld [vmem:[#allocation8 + $0x2ec] sm:$0xf]  ;;  %v1663_v30 = vld [vmem:[#allocation8 + $0x2f4] sm:$0xf0]  ;;  %v1522_v31 = vor.u32 %v1828_v26, %v1519_v28  ;;  %v1399_v34 = vld [vmem:[#allocation8 + $0xe4] sm:$0xf0] }
  0x3c   :  { %857 = vmatpush.bf16.msra.mxu0 %v1290_v46  ;;  %883 = vmatpush.bf16.msrb.mxu2 %v1482_v47  ;;  %v1666_v32 = vor.u32 %v1864_v29, %v1663_v30  ;;  %v1402_v35 = vor.u32 %v1798_v33, %v1399_v34  ;;  %v1777_v36 = vld [vmem:[#allocation8 + $0x34] sm:$0xf]  ;;  %v1315_v37 = vld [vmem:[#allocation8 + $0x3c] sm:$0xf0]  ;;  %v1795_v45 = vld [vmem:[#allocation8 + $0xc4] sm:$0xf] }
  0x3d   :  { %v1825_v38 = vld [vmem:[#allocation8 + $0x1b4] sm:$0xf]  ;;  %v1318_v39 = vor.u32 %v1777_v36, %v1315_v37  ;;  %v1507_v40 = vld [vmem:[#allocation8 + $0x1bc] sm:$0xf0]  ;;  %v1387_v46 = vld [vmem:[#allocation8 + $0xcc] sm:$0xf0] }
  0x3e   :  { %895 = vmatpush.bf16.msra.mxu3 %v1590_v2  ;;  %v1651_v42 = vld [vmem:[#allocation8 + $0x2dc] sm:$0xf0]  ;;  %v1510_v43 = vor.u32 %v1825_v38, %v1507_v40  ;;  %v1390_v47 = vor.u32 %v1795_v45, %v1387_v46  ;;  %v1822_v50 = vld [vmem:[#allocation8 + $0x19c] sm:$0xf]  ;;  %v1495_v52 = vld [vmem:[#allocation8 + $0x1a4] sm:$0xf0] }
  0x3f   :  { %915 = vmatpush.bf16.msra.mxu1 %v1474_v41  ;;  %v1861_v41 = vld [vmem:[#allocation8 + $0x2d4] sm:$0xf]  ;;  %v1858_v53 = vld [vmem:[#allocation8 + $0x2bc] sm:$0xf]  ;;  %v1639_v54 = vld [vmem:[#allocation8 + $0x2c4] sm:$0xf0] }
  0x40   :  { %902 = vmatpush.bf16.msrb.mxu0 %v1378_v48  ;;  %928 = vmatpush.bf16.msra.mxu2 %v1570_v49  ;;  %v1654_v44 = vor.u32 %v1861_v41, %v1651_v42  ;;  %v1774_v48 = vld [vmem:[#allocation8 + $0x1c] sm:$0xf]  ;;  %v1303_v49 = vld [vmem:[#allocation8 + $0x24] sm:$0xf0]  ;;  %v1642_v56 = vor.u32 %v1858_v53, %v1639_v54  ;;  %v1771_v57 = vld [vmem:[#allocation8 + $0x4] sm:$0xf] }
  0x41   :  { %v1306_v51 = vor.u32 %v1774_v48, %v1303_v49  ;;  %v1291_v58 = vld [vmem:[#allocation8 + $0xc] sm:$0xf0]  ;;  %v1819_v59 = vld [vmem:[#allocation8 + $0x184] sm:$0xf]  ;;  %v1852_v2 = vld [vmem:[#allocation8 + $0x28c] sm:$0xf] }
  0x42   :  { %896 = vmatpush.bf16.msra.mxu3 %v1578_v24  ;;  %v1855_v62 = vld [vmem:[#allocation8 + $0x2a4] sm:$0xf]  ;;  %v1627_v63 = vld [vmem:[#allocation8 + $0x2ac] sm:$0xf0]  ;;  %v1849_v5 = vld [vmem:[#allocation8 + $0x274] sm:$0xf] }
  0x43   :  { %916 = vmatpush.bf16.msra.mxu1 %v1462_v55  ;;  %v1498_v55 = vor.u32 %v1822_v50, %v1495_v52  ;;  %v1630_v1 = vor.u32 %v1855_v62, %v1627_v63  ;;  %v1846_v8 = vld [vmem:[#allocation8 + $0x25c] sm:$0xf]  ;;  %v1591_v9 = vld [vmem:[#allocation8 + $0x264] sm:$0xf0]  ;;  %v1579_v14 = vld [vmem:[#allocation8 + $0x24c] sm:$0xf0] }
  0x44   :  { %903 = vmatpush.bf16.msrb.mxu0 %v1366_v60  ;;  %929 = vmatpush.bf16.msra.mxu2 %v1558_v61  ;;  %v1294_v60 = vor.u32 %v1771_v57, %v1291_v58  ;;  %v1483_v61 = vld [vmem:[#allocation8 + $0x18c] sm:$0xf0]  ;;  %v1594_v10 = vor.u32 %v1846_v8, %v1591_v9  ;;  %v2133_v11 = vld [vmem:[#allocation7] sm:$0xf]  ;;  %v1465_v26 = vld [vmem:[#allocation8 + $0x158] sm:$0xf] }
  0x45   :  { %v1486_v0 = vor.u32 %v1819_v59, %v1483_v61  ;;  %v1477_v19 = vld [vmem:[#allocation8 + $0x170] sm:$0xf]  ;;  %v1818_v20 = vld [vmem:[#allocation8 + $0x178] sm:$0xf0]  ;;  %v112_v23 = vperm.slane %v2133_v11, 2  ;;  %s1255_s11 = sshll.u32 %s2175_s7, 4  ;;  %s1256_s11 = int_to_ptr.hbm [resolvable:$true] %s1255_s11 }
  0x46   :  { %941 = vmatpush.bf16.msrb.mxu3 %v1666_v32  ;;  %v1478_v24 = vor.u32 %v1818_v20, %v1477_v19  ;;  %v1381_v30 = vld [vmem:[#allocation8 + $0xb0] sm:$0xf]  ;;  %v1842_v34 = vld [vmem:[#allocation8 + $0x238] sm:$0xf0]  ;;  %v1453_v40 = vld [vmem:[#allocation8 + $0x140] sm:$0xf] }
  0x47   :  { %917 = vmatpush.bf16.msra.mxu1 %v1450_v3  ;;  %v1615_v3 = vld [vmem:[#allocation8 + $0x294] sm:$0xf0]  ;;  %v1573_v33 = vld [vmem:[#allocation8 + $0x230] sm:$0xf]  ;;  %v1812_v41 = vld [vmem:[#allocation8 + $0x148] sm:$0xf0] }
  0x48   :  { %904 = vmatpush.bf16.msrb.mxu0 %v1354_v6  ;;  %930 = vmatpush.bf16.msra.mxu2 %v1546_v7  ;;  %v1618_v4 = vor.u32 %v1852_v2, %v1615_v3  ;;  %v1603_v6 = vld [vmem:[#allocation8 + $0x27c] sm:$0xf0]  ;;  %v1791_v45 = vld [vmem:[#allocation8 + $0xa0] sm:$0xf0]  ;;  %v1454_v49 = vor.u32 %v1812_v41, %v1453_v40  ;;  %v1441_v52 = vld [vmem:[#allocation8 + $0x128] sm:$0xf] }
  0x49   :  { %v1606_v7 = vor.u32 %v1849_v5, %v1603_v6  ;;  %v1839_v48 = vld [vmem:[#allocation8 + $0x220] sm:$0xf0]  ;;  %v1809_v53 = vld [vmem:[#allocation8 + $0x130] sm:$0xf0]  ;;  %v1788_v57 = vld [vmem:[#allocation8 + $0x88] sm:$0xf0] }
  0x4a   :  { %942 = vmatpush.bf16.msrb.mxu3 %v1654_v44  ;;  %v1369_v44 = vld [vmem:[#allocation8 + $0x98] sm:$0xf]  ;;  %v1549_v58 = vld [vmem:[#allocation8 + $0x200] sm:$0xf]  ;;  %v1836_v59 = vld [vmem:[#allocation8 + $0x208] sm:$0xf0] }
  0x4b   :  { %918 = vmatpush.bf16.msra.mxu1 %v1438_v13  ;;  %v1843_v13 = vld [vmem:[#allocation8 + $0x244] sm:$0xf]  ;;  %v1429_v62 = vld [vmem:[#allocation8 + $0x110] sm:$0xf]  ;;  %v1806_v63 = vld [vmem:[#allocation8 + $0x118] sm:$0xf0] }
  0x4c   :  { %905 = vmatpush.bf16.msrb.mxu0 %v1342_v16  ;;  %931 = vmatpush.bf16.msra.mxu2 %v1534_v17  ;;  %v1582_v15 = vor.u32 %v1843_v13, %v1579_v14  ;;  %v111_v16 = vperm.slane %v2133_v11, 1  ;;  %v1345_v2 = vld [vmem:[#allocation8 + $0x68] sm:$0xf]  ;;  %v1785_v3 = vld [vmem:[#allocation8 + $0x70] sm:$0xf0]  ;;  %v1430_v6 = vor.u32 %v1806_v63, %v1429_v62 }
  0x4d   :  { %v1833_v5 = vld [vmem:[#allocation8 + $0x1f0] sm:$0xf0]  ;;  %v1346_v8 = vor.u32 %v1785_v3, %v1345_v2  ;;  %v1417_v9 = vld [vmem:[#allocation8 + $0xf8] sm:$0xf]  ;;  %v1669_v20 = vld [vmem:[#allocation8 + $0x2f0] sm:$0xf] }
  0x4e   :  { %943 = vmatpush.bf16.msrb.mxu3 %v1642_v56  ;;  %v1357_v56 = vld [vmem:[#allocation8 + $0x80] sm:$0xf]  ;;  %v1621_v62 = vld [vmem:[#allocation8 + $0x290] sm:$0xf]  ;;  %v1854_v63 = vld [vmem:[#allocation8 + $0x298] sm:$0xf0] }
  0x4f   :  { %919 = vmatpush.bf16.msra.mxu1 %v1426_v18  ;;  %v1358_v61 = vor.u32 %v1788_v57, %v1357_v56  ;;  %v1309_v40 = vld [vmem:[#allocation8 + $0x20] sm:$0xf]  ;;  %v1821_v56 = vld [vmem:[#allocation8 + $0x190] sm:$0xf0]  ;;  %v1633_v57 = vld [vmem:[#allocation8 + $0x2a8] sm:$0xf] }
  0x50   :  { %906 = vmatpush.bf16.msrb.mxu0 %v1330_v27  ;;  %932 = vmatpush.bf16.msra.mxu2 %v1522_v31  ;;  %v1815_v27 = vld [vmem:[#allocation8 + $0x160] sm:$0xf0]  ;;  %v1794_v31 = vld [vmem:[#allocation8 + $0xb8] sm:$0xf0] }
  0x51   :  { %v1466_v36 = vor.u32 %v1815_v27, %v1465_v26  ;;  %v1321_v27 = vld [vmem:[#allocation8 + $0x38] sm:$0xf]  ;;  %v1851_v2 = vld [vmem:[#allocation8 + $0x280] sm:$0xf0] }
  0x52   :  { %944 = vmatpush.bf16.msrb.mxu3 %v1630_v1  ;;  %v1550_v1 = vor.u32 %v1836_v59, %v1549_v58  ;;  %v1857_v58 = vld [vmem:[#allocation8 + $0x2b0] sm:$0xf0] }
  0x53   :  { %920 = vmatpush.bf16.msra.mxu1 %v1414_v21  ;;  %v110_v21 = vperm.slane %v2133_v11, 0 }
  0x54   :  { %907 = vmatpush.bf16.msrb.mxu0 %v1318_v39  ;;  %933 = vmatpush.bf16.msra.mxu2 %v1510_v43  ;;  %v1382_v39 = vor.u32 %v1794_v31, %v1381_v30  ;;  %v1574_v43 = vor.u32 %v1842_v34, %v1573_v33  ;;  %v1513_v30 = vld [vmem:[#allocation8 + $0x1b8] sm:$0xf]  ;;  %v1827_v31 = vld [vmem:[#allocation8 + $0x1c0] sm:$0xf0] }
  0x55   :  { %v1657_v33 = vld [vmem:[#allocation8 + $0x2d8] sm:$0xf]  ;;  %v1863_v34 = vld [vmem:[#allocation8 + $0x2e0] sm:$0xf0] }
  0x56   :  { %945 = vmatpush.bf16.msrb.mxu3 %v1618_v4  ;;  %v1537_v4 = vld [vmem:[#allocation8 + $0x1e8] sm:$0xf]  ;;  %v1658_v41 = vor.u32 %v1863_v34, %v1657_v33  ;;  %v1887_v33 = vld [vmem:[#allocation10 + $0xa0] sm:$0xff] }
  0x57   :  { %921 = vmatpush.bf16.msra.mxu1 %v1402_v35  ;;  %v1538_v14 = vor.u32 %v1833_v5, %v1537_v4  ;;  %v1597_v4 = vld [vmem:[#allocation8 + $0x260] sm:$0xf]  ;;  %v1848_v5 = vld [vmem:[#allocation8 + $0x268] sm:$0xf0] }
  0x58   :  { %908 = vmatpush.bf16.msrb.mxu0 %v1306_v51  ;;  %934 = vmatpush.bf16.msra.mxu2 %v1498_v55  ;;  %v1370_v51 = vor.u32 %v1791_v45, %v1369_v44  ;;  %v1501_v44 = vld [vmem:[#allocation8 + $0x1a0] sm:$0xf]  ;;  %v1824_v45 = vld [vmem:[#allocation8 + $0x1a8] sm:$0xf0] }
  0x5a   :  { %946 = vmatpush.bf16.msrb.mxu3 %v1606_v7 }
  0x5b   :  { %922 = vmatpush.bf16.msra.mxu1 %v1390_v47  ;;  %v1561_v47 = vld [vmem:[#allocation8 + $0x218] sm:$0xf] }
  0x5c   :  { %909 = vmatpush.bf16.msrb.mxu0 %v1294_v60  ;;  %935 = vmatpush.bf16.msra.mxu2 %v1486_v0  ;;  %v1562_v54 = vor.u32 %v1839_v48, %v1561_v47  ;;  %v1442_v60 = vor.u32 %v1809_v53, %v1441_v52  ;;  %v113_v0 = vperm.slane %v2133_v11, 3  ;;  %v1525_v11 = vld [vmem:[#allocation8 + $0x1d0] sm:$0xf]  ;;  %v1645_v48 = vld [vmem:[#allocation8 + $0x2c0] sm:$0xf] }
  0x5d   :  { %v1297_v52 = vld [vmem:[#allocation8 + $0x8] sm:$0xf] }
  0x5e   :  { %947 = vmatpush.bf16.msrb.mxu3 %v1594_v10  ;;  %v1803_v10 = vld [vmem:[#allocation8 + $0x100] sm:$0xf0] }
  0x5f   :  { %v1418_v19 = vor.u32 %v1803_v10, %v1417_v9  ;;  %v1874_v9 = vld [vmem:[#allocation10 + $0x38] sm:$0xff]  ;;  %v1873_v10 = vld [vmem:[#allocation10 + $0x30] sm:$0xff] }
  0x62   :  { %948 = vmatpush.bf16.msrb.mxu3 %v1582_v15  ;;  %v1333_v15 = vld [vmem:[#allocation8 + $0x50] sm:$0xf] }
  0x9b   :  { %v164_v17 = vpop.f32.mrf.mxu1 }
  0x9c   :  { %v165_v18 = vadd.f32 %v164_v17, %v111_v16  ;;  %v1782_v16 = vld [vmem:[#allocation8 + $0x58] sm:$0xf0] }
  0x9d   :  { %v1830_v17 = vld [vmem:[#allocation8 + $0x1d8] sm:$0xf0] }
  0x9e   :  { %v195_v22 = vmax.f32 %v165_v18, 0.0  ;;  %v1526_v26 = vor.u32 %v1830_v17, %v1525_v11  ;;  %v1868_v11 = vld [vmem:[#allocation10 + $0x8] sm:$0xff] }
  0x9f   :  { %v1880_v17 = vld [vmem:[#allocation10 + $0x68] sm:$0xff] }
  0xa0   :  { %v2138_v12 = vpack.c.bf16 %v195_v22, %v195_v22  ;;  %v151_v25 = vpop.f32.mrf.mxu3  ;;  %v1405_v22 = vld [vmem:[#allocation8 + $0xe0] sm:$0xf] }
  0xa1   :  { %v152_v28 = vadd.f32 %v151_v25, %v110_v21  ;;  %v1866_v21 = vld [vmem:[#allocation8 + $0x2f8] sm:$0xf0]  ;;  %v1334_v25 = vor.u32 %v1782_v16, %v1333_v15  ;;  %v1869_v15 = vld [vmem:[#allocation10 + $0x10] sm:$0xff] }
  0xa2   :  { %v177_v29 = vpop.f32.mrf.mxu2  ;;  %871 = vmatmul.bf16.vlgmr.msrb.gmra.mxu1 %v2138_v12  ;;  %v1881_v16 = vld [vmem:[#allocation10 + $0x70] sm:$0xff] }
  0xa3   :  { %v178_v32 = vadd.f32 %v177_v29, %v112_v23  ;;  %v194_v35 = vmax.f32 %v152_v28, 0.0  ;;  %967 = vmatpush.bf16.msrb.mxu1 %v1478_v24  ;;  %v166_v37 = vpop.f32.mrf.mxu1  ;;  %v1800_v23 = vld [vmem:[#allocation8 + $0xe8] sm:$0xf0]  ;;  %v1670_v28 = vor.u32 %v1866_v21, %v1669_v20  ;;  %v1779_v29 = vld [vmem:[#allocation8 + $0x40] sm:$0xf0]  ;;  %v1878_v21 = vld [vmem:[#allocation10 + $0x58] sm:$0xff] }
  0xa4   :  { %v1797_v37 = vld [vmem:[#allocation8 + $0xd0] sm:$0xf0] }
  0xa5   :  { %v196_v38 = vmax.f32 %v178_v32, 0.0  ;;  %v2141_v42 = vpack.c.bf16 %v194_v35, %v194_v35  ;;  %v1406_v32 = vor.u32 %v1800_v23, %v1405_v22  ;;  %v1890_v22 = vld [vmem:[#allocation10 + $0xb8] sm:$0xff] }
  0xa7   :  { %v2143_v46 = vpack.c.bf16 %v196_v38, %v196_v38  ;;  %968 = vmatpush.bf16.msrb.mxu1 %v1466_v36  ;;  %858 = vmatmul.bf16.vlgmr.msra.gmra.mxu0 %v2141_v42  ;;  %v1393_v36 = vld [vmem:[#allocation8 + $0xc8] sm:$0xf]  ;;  %v1322_v38 = vor.u32 %v1779_v29, %v1321_v27 }
  0xa8   :  { %v153_v50 = vpop.f32.mrf.mxu3  ;;  %954 = vmatpush.bf16.msra.mxu0 %v1382_v39  ;;  %v1514_v39 = vor.u32 %v1827_v31, %v1513_v30  ;;  %v1394_v47 = vor.u32 %v1797_v37, %v1393_v36  ;;  %v1876_v27 = vld [vmem:[#allocation10 + $0x48] sm:$0xff]  ;;  %v330_v30 = vld [vmem:[%s2172_s4] sm:$0x7]  ;;  %v1886_v36 = vld [vmem:[#allocation10 + $0x98] sm:$0xff] }
  0xa9   :  { %884 = vmatmul.bf16.vlgmr.msrb.gmra.mxu2 %v2143_v46  ;;  %v332_v34 = vperm.slane %v330_v30, 0 }
  0xaa   :  { %980 = vmatpush.bf16.msrb.mxu2 %v1574_v43  ;;  %v179_v55 = vpop.f32.mrf.mxu2  ;;  %v1776_v43 = vld [vmem:[#allocation8 + $0x28] sm:$0xf0] }
  0xab   :  { %969 = vmatpush.bf16.msrb.mxu1 %v1454_v49  ;;  %v1860_v49 = vld [vmem:[#allocation8 + $0x2c8] sm:$0xf0]  ;;  %v1310_v50 = vor.u32 %v1776_v43, %v1309_v40  ;;  %v1489_v55 = vld [vmem:[#allocation8 + $0x188] sm:$0xf] }
  0xac   :  { %955 = vmatpush.bf16.msra.mxu0 %v1370_v51  ;;  %v1502_v51 = vor.u32 %v1824_v45, %v1501_v44  ;;  %v1646_v53 = vor.u32 %v1860_v49, %v1645_v48 }
  0xae   :  { %981 = vmatpush.bf16.msrb.mxu2 %v1562_v54  ;;  %v1773_v54 = vld [vmem:[#allocation8 + $0x10] sm:$0xf0] }
  0xaf   :  { %970 = vmatpush.bf16.msrb.mxu1 %v1442_v60  ;;  %v1298_v59 = vor.u32 %v1773_v54, %v1297_v52  ;;  %v1490_v60 = vor.u32 %v1821_v56, %v1489_v55  ;;  %v1883_v52 = vld [vmem:[#allocation10 + $0x80] sm:$0xff] }
  0xb0   :  { %v190_v7 = vpop.f32.mrf.mxu3  ;;  %956 = vmatpush.bf16.msra.mxu0 %v1358_v61  ;;  %v1634_v61 = vor.u32 %v1857_v58, %v1633_v57 }
  0xb1   :  { %v191_v13 = vadd.f32 %v190_v7, %v113_v0  ;;  %v1622_v0 = vor.u32 %v1854_v63, %v1621_v62  ;;  %v1845_v7 = vld [vmem:[#allocation8 + $0x250] sm:$0xf0] }
  0xb2   :  { %982 = vmatpush.bf16.msrb.mxu2 %v1550_v1  ;;  %923 = vmatmul.bf16.vlgmr.msra.gmra.mxu1 %v2138_v12  ;;  %v1609_v1 = vld [vmem:[#allocation8 + $0x278] sm:$0xf] }
  0xb3   :  { %v197_v18 = vmax.f32 %v191_v13, 0.0  ;;  %971 = vmatpush.bf16.msrb.mxu1 %v1430_v6  ;;  %v1610_v3 = vor.u32 %v1851_v2, %v1609_v1  ;;  %v1585_v6 = vld [vmem:[#allocation8 + $0x248] sm:$0xf]  ;;  %v1870_v13 = vld [vmem:[#allocation10 + $0x18] sm:$0xff] }
  0xb4   :  { %957 = vmatpush.bf16.msra.mxu0 %v1346_v8  ;;  %v1586_v8 = vor.u32 %v1845_v7, %v1585_v6 }
  0xb5   :  { %v2149_v24 = vpack.c.bf16 %v197_v18, %v197_v18  ;;  %v1867_v18 = vld [vmem:[#allocation10] sm:$0xff] }
  0xb6   :  { %983 = vmatpush.bf16.msrb.mxu2 %v1538_v14  ;;  %v1882_v14 = vld [vmem:[#allocation10 + $0x78] sm:$0xff] }
  0xb7   :  { %972 = vmatpush.bf16.msrb.mxu1 %v1418_v19  ;;  %897 = vmatmul.bf16.vlgmr.msra.gmra.mxu3 %v2149_v24  ;;  %v1879_v19 = vld [vmem:[#allocation10 + $0x60] sm:$0xff] }
  0xb8   :  { %910 = vmatmul.bf16.vlgmr.msrb.gmra.mxu0 %v2141_v42  ;;  %v192_v35 = vpop.f32.mrf.mxu3  ;;  %993 = vmatpush.bf16.msra.mxu3 %v1670_v28  ;;  %v1888_v28 = vld [vmem:[#allocation10 + $0xa8] sm:$0xff] }
  0xb9   :  { %936 = vmatmul.bf16.vlgmr.msra.gmra.mxu2 %v2143_v46  ;;  %958 = vmatpush.bf16.msra.mxu0 %v1334_v25  ;;  %v1889_v25 = vld [vmem:[#allocation10 + $0xb0] sm:$0xff] }
  0xba   :  { %984 = vmatpush.bf16.msrb.mxu2 %v1526_v26 }
  0xbb   :  { %973 = vmatpush.bf16.msrb.mxu1 %v1406_v32  ;;  %v1875_v32 = vld [vmem:[#allocation10 + $0x40] sm:$0xff] }
  0xbc   :  { %994 = vmatpush.bf16.msra.mxu3 %v1658_v41 }
  0xbd   :  { %959 = vmatpush.bf16.msra.mxu0 %v1322_v38 }
  0xbe   :  { %985 = vmatpush.bf16.msrb.mxu2 %v1514_v39  ;;  %v1885_v39 = vld [vmem:[#allocation10 + $0x90] sm:$0xff] }
  0xbf   :  { %974 = vmatpush.bf16.msrb.mxu1 %v1394_v47  ;;  %v1884_v47 = vld [vmem:[#allocation10 + $0x88] sm:$0xff] }
  0xc0   :  { %995 = vmatpush.bf16.msra.mxu3 %v1646_v53  ;;  %v333_v53 = vperm.slane %v330_v30, 1 }
  0xc1   :  { %960 = vmatpush.bf16.msra.mxu0 %v1310_v50 }
  0xc2   :  { %986 = vmatpush.bf16.msrb.mxu2 %v1502_v51  ;;  %975 = vmatmul.bf16.vlgmr.msrb.gmra.mxu1 %v2138_v12  ;;  %v1598_v12 = vor.u32 %v1848_v5, %v1597_v4  ;;  %v334_v5 = vperm.slane %v330_v30, 2 }
  0xc3   :  { %1221 = vmatpush.bf16.msra.mxu1 %v1882_v14 }
  0xc4   :  { %996 = vmatpush.bf16.msra.mxu3 %v1634_v61 }
  0xc5   :  { %961 = vmatpush.bf16.msra.mxu0 %v1298_v59 }
  0xc6   :  { %987 = vmatpush.bf16.msrb.mxu2 %v1490_v60 }
  0xc7   :  { %949 = vmatmul.bf16.vlgmr.msrb.gmra.mxu3 %v2149_v24  ;;  %1222 = vmatpush.bf16.msra.mxu1 %v1881_v16 }
  0xc8   :  { %962 = vmatmul.bf16.vlgmr.msra.gmra.mxu0 %v2141_v42  ;;  %997 = vmatpush.bf16.msra.mxu3 %v1622_v0  ;;  %v1872_v42 = vld [vmem:[#allocation10 + $0x28] sm:$0xff] }
  0xc9   :  { %988 = vmatmul.bf16.vlgmr.msrb.gmra.mxu2 %v2143_v46  ;;  %1208 = vmatpush.bf16.msrb.mxu0 %v1874_v9  ;;  %v1871_v46 = vld [vmem:[#allocation10 + $0x20] sm:$0xff] }
  0xca   :  { %1234 = vmatpush.bf16.msra.mxu2 %v1890_v22 }
  0xcb   :  { %1223 = vmatpush.bf16.msra.mxu1 %v1880_v17 }
  0xcc   :  { %998 = vmatpush.bf16.msra.mxu3 %v1610_v3 }
  0xcd   :  { %1209 = vmatpush.bf16.msrb.mxu0 %v1873_v10 }
  0xce   :  { %1235 = vmatpush.bf16.msra.mxu2 %v1889_v25 }
  0xcf   :  { %1224 = vmatpush.bf16.msra.mxu1 %v1879_v19 }
  0xd0   :  { %999 = vmatpush.bf16.msra.mxu3 %v1598_v12 }
  0xd1   :  { %1210 = vmatpush.bf16.msrb.mxu0 %v1872_v42 }
  0xd2   :  { %1236 = vmatpush.bf16.msra.mxu2 %v1888_v28 }
  0xd3   :  { %1225 = vmatpush.bf16.msra.mxu1 %v1878_v21 }
  0xd4   :  { %1000 = vmatpush.bf16.msra.mxu3 %v1586_v8 }
  0xd5   :  { %1211 = vmatpush.bf16.msrb.mxu0 %v1871_v46 }
  0xd6   :  { %1237 = vmatpush.bf16.msra.mxu2 %v1887_v33 }
  0xd7   :  { %1001 = vmatmul.bf16.vlgmr.msra.gmra.mxu3 %v2149_v24  ;;  %v1877_v24 = vld [vmem:[#allocation10 + $0x50] sm:$0xff] }
  0xd8   :  { %1226 = vmatpush.bf16.msra.mxu1 %v1877_v24 }
  0xd9   :  { %1212 = vmatpush.bf16.msrb.mxu0 %v1870_v13 }
  0xda   :  { %1238 = vmatpush.bf16.msra.mxu2 %v1886_v36 }
  0xdc   :  { %1227 = vmatpush.bf16.msra.mxu1 %v1876_v27 }
  0xdd   :  { %1213 = vmatpush.bf16.msrb.mxu0 %v1869_v15 }
  0xde   :  { %1239 = vmatpush.bf16.msra.mxu2 %v1885_v39 }
  0xe0   :  { %1228 = vmatpush.bf16.msra.mxu1 %v1875_v32 }
  0xe1   :  { %1214 = vmatpush.bf16.msrb.mxu0 %v1868_v11 }
  0xe2   :  { %1240 = vmatpush.bf16.msra.mxu2 %v1884_v47 }
  0xe5   :  { %1215 = vmatpush.bf16.msrb.mxu0 %v1867_v18  ;;  %v1903_v18 = vld [vmem:[%s2174_s6] ss:$0 sm:$0xff] }
  0xe6   :  { %1241 = vmatpush.bf16.msra.mxu2 %v1883_v52 }
 0x11f   :  { %v872_v20 = vpop.f32.mrf.mxu1 }
 0x124   :  { %v859_v23 = vpop.f32.mrf.mxu0 }
 0x125   :  { %v860_v37 = vadd.f32 %v859_v23, %v332_v34 }
 0x127   :  { %v874_v26 = vpop.f32.mrf.mxu1  ;;  %v873_v41 = vadd.f32 %v872_v20, %v860_v37 }
 0x12c   :  { %v885_v29 = vpop.f32.mrf.mxu2  ;;  %v861_v31 = vpop.f32.mrf.mxu0 }
 0x12d   :  { %v886_v44 = vadd.f32 %v885_v29, %v873_v41 }
 0x12f   :  { %v924_v35 = vpop.f32.mrf.mxu1 }
 0x134   :  { %v887_v38 = vpop.f32.mrf.mxu2 }
 0x135   :  { %v911_v40 = vpop.f32.mrf.mxu0 }
 0x136   :  { %v912_v57 = vadd.f32 %v911_v40, %v333_v53 }
 0x137   :  { %v926_v43 = vpop.f32.mrf.mxu1 }
 0x138   :  { %v925_v60 = vadd.f32 %v924_v35, %v912_v57 }
 0x13a   :  { %v898_v45 = vpop.f32.mrf.mxu3 }
 0x13b   :  { %v899_v48 = vadd.f32 %v898_v45, %v886_v44 }
 0x13c   :  { %v937_v49 = vpop.f32.mrf.mxu2 }
 0x13d   :  { %v1006_v50 = vmax.f32 %v899_v48, 0.0  ;;  %v913_v51 = vpop.f32.mrf.mxu0  ;;  %v938_v62 = vadd.f32 %v937_v49, %v925_v60 }
 0x13f   :  { %v1009_v54 = vpack.c.bf16 %v1006_v50, %v1006_v50  ;;  %v976_v55 = vpop.f32.mrf.mxu1 }
 0x141   :  { %1216 = vmatmul.bf16.vlgmr.msrb.gmra.mxu0 %v1009_v54 }
 0x142   :  { %v900_v56 = vpop.f32.mrf.mxu3 }
 0x144   :  { %v939_v58 = vpop.f32.mrf.mxu2 }
 0x145   :  { %v963_v59 = vpop.f32.mrf.mxu0 }
 0x146   :  { %v964_v7 = vadd.f32 %v963_v59, %v334_v5 }
 0x147   :  { %v978_v61 = vpop.f32.mrf.mxu1 }
 0x148   :  { %v977_v8 = vadd.f32 %v976_v55, %v964_v7 }
 0x14a   :  { %v950_v63 = vpop.f32.mrf.mxu3 }
 0x14b   :  { %v951_v0 = vadd.f32 %v950_v63, %v938_v62 }
 0x14c   :  { %v989_v1 = vpop.f32.mrf.mxu2 }
 0x14d   :  { %v1007_v2 = vmax.f32 %v951_v0, 0.0  ;;  %v965_v3 = vpop.f32.mrf.mxu0  ;;  %v990_v9 = vadd.f32 %v989_v1, %v977_v8 }
 0x14f   :  { %v1010_v4 = vpack.c.bf16 %v1007_v2, %v1007_v2 }
 0x151   :  { %1229 = vmatmul.bf16.vlgmr.msra.gmra.mxu1 %v1010_v4 }
 0x152   :  { %v952_v12 = vpop.f32.mrf.mxu3 }
 0x154   :  { %v991_v6 = vpop.f32.mrf.mxu2 }
 0x15a   :  { %v1002_v10 = vpop.f32.mrf.mxu3 }
 0x15b   :  { %v1003_v42 = vadd.f32 %v1002_v10, %v990_v9 }
 0x15d   :  { %v1008_v46 = vmax.f32 %v1003_v42, 0.0 }
 0x15f   :  { %v1011_v13 = vpack.c.bf16 %v1008_v46, %v1008_v46 }
 0x161   :  { %1242 = vmatmul.bf16.vlgmr.msra.gmra.mxu2 %v1011_v13 }
 0x162   :  { %v1004_v14 = vpop.f32.mrf.mxu3 }
 0x1be   :  { %v1217_v15 = vpop.f32.mrf.mxu0 }
 0x1bf   :  { %v1218_v19 = vadd.f32 %v1903_v18, %v1217_v15 }
 0x1c6   :  { %v1219_v16 = vpop.f32.mrf.mxu0 }
 0x1ce   :  { %v1230_v11 = vpop.f32.mrf.mxu1 }
 0x1cf   :  { %v1231_v20 = vadd.f32 %v1230_v11, %v1218_v19 }
 0x1d6   :  { %v1232_v17 = vpop.f32.mrf.mxu1 }
 0x1e4   :  { %v1243_v21 = vpop.f32.mrf.mxu2 }
 0x1e5   :  { %v1244_v22 = vadd.f32 %v1243_v21, %v1231_v20 }
 0x1e7   :  { %1247 = vst [vmem:[#allocation11] sm:$0xff] %v1244_v22 }
 0x1e8   :  { %1258 = dma.vmem_to_hbm [thread:$0]  %s1254_s8, 128, %s1256_s11, [#allocation4]  }
 0x1ec   :  { %v1245_v23 = vpop.f32.mrf.mxu2 }
 0x1ed   :  { %2054 = dma.done.wait [#allocation4], 128  }
 0x1ee   :  { %2055 = vsyncadd [#allocation4], 4294967168 }
 0x1ef   :  { %1263 = vsyncpa [#allocation3], 1 }
 0x1f0   :  { %1264 = vsyncpa [#allocation6], 1 }
 0x1f1   :  { %1265 = vsyncpa [#allocation9], 1 }
 0x1f2   :  { %1266 = vsyncpa [#allocation4], 1 }

</bundles_post_ra>
